<compile_context>
chip_gen: v7x
topology: tpu7x:2x2x1
jax: 0.10.0
libtpu: 0.0.40
codegen_flags: <defaults>
</compile_context>

<pallas_src>
import functools

import jax
import jax.numpy as jnp
from jax import lax
from jax.experimental import pallas as pl
from jax.experimental.pallas import tpu as pltpu


TILE = 128       # tile for the dense adjacency matmul (row & reduction axes)
D_PAD = 128      # padded input/hidden feature width (lane-dense)
OUT_PAD = 128    # padded number of classes (lane-dense output stores)
NEG_INF = -1e30  # softmax mask for padded class columns


# ----------------------------------------------------------------------------
# Fused Pallas kernel: all SAGE layers + post_mp + log_softmax
# ----------------------------------------------------------------------------
def fused_gnn_kernel(x_in_ref, a_ref, wl_ref, wr_ref, b_ref,
                     w1_ref, b1_ref, w2_ref, b2_ref,
                     o_ref, acc_ref, xbuf_ref, *, nb, tile):
    l = pl.program_id(0)          # layer
    i = pl.program_id(1)          # output row tile
    k = pl.program_id(2)          # reduction (neighbor) tile, innermost
    num_layers = pl.num_programs(0)
    num_k = pl.num_programs(2)

    # One-time staging of the (padded, bf16) input features into ping-pong
    # slot 1.  Layer l reads slot (l+1) % 2 and writes slot l % 2.
    @pl.when((l == 0) & (i == 0) & (k == 0))
    def _():
        xbuf_ref[pl.ds(nb, nb)] = x_in_ref[...]

    @pl.when(k == 0)
    def _():
        acc_ref[...] = jnp.zeros_like(acc_ref)

    rd = ((l + 1) % 2) * nb       # base slab index of the read slot

    # Mean-aggregation partial sum on the MXU:  acc += A[i, k] @ X[k]
    acc_ref[...] += jnp.dot(a_ref[...], xbuf_ref[rd + k],
                            preferred_element_type=jnp.float32)

    @pl.when(k == num_k - 1)
    def _():
        x_i = xbuf_ref[rd + i]
        h = (jnp.dot(x_i, wl_ref[0], preferred_element_type=jnp.float32)
             + jnp.dot(acc_ref[...].astype(jnp.bfloat16), wr_ref[0],
                       preferred_element_type=jnp.float32)
             + b_ref[0])
        # F.normalize(p=2, dim=-1): rsqrt of the squared norm (EUP slot);
        # clamp at 1e-24 == (1e-12)^2 to match torch's eps behavior.
        sq = jnp.sum(h * h, axis=-1, keepdims=True)
        h = h * lax.rsqrt(jnp.maximum(sq, 1e-24))
        h = jnp.maximum(h, 0.0)                      # relu; dropout == identity (eval)
        xbuf_ref[(l % 2) * nb + i] = h.astype(jnp.bfloat16)

        # Last layer: fused post_mp (Linear -> Dropout(id) -> Linear) + log_softmax.
        @pl.when(l == num_layers - 1)
        def _():
            h1 = (jnp.dot(h.astype(jnp.bfloat16), w1_ref[...],
                          preferred_element_type=jnp.float32) + b1_ref[...])
            logits = (jnp.dot(h1.astype(jnp.bfloat16), w2_ref[...],
                              preferred_element_type=jnp.float32) + b2_ref[...])
            m = jnp.max(logits, axis=-1, keepdims=True)
            lse = jnp.log(jnp.sum(jnp.exp(logits - m), axis=-1, keepdims=True)) + m
            row0 = pl.multiple_of(i * tile, tile)
            o_ref[pl.ds(row0, tile), :] = logits - lse


# ----------------------------------------------------------------------------
# Wrapper: pad to lane-dense shapes, stack per-layer weights, call the kernel
# ----------------------------------------------------------------------------
def _round_up(x, m):
    return (x + m - 1) // m * m


def _pad_to(a, shape):
    out = jnp.zeros(shape, a.dtype)
    return out.at[tuple(slice(0, s) for s in a.shape)].set(a)


@jax.jit
def gnn_stack_forward(x, a_norm, params):
    n, in_dim = x.shape
    num_layers = len(params["convs"])
    hid_dim = params["post1"][0].shape[0]
    out_dim = params["post2"][0].shape[1]
    assert num_layers >= 1, "Number of layers is not >=1"
    assert max(in_dim, hid_dim) <= D_PAD and out_dim <= OUT_PAD

    n_pad = _round_up(n, TILE)
    nb = n_pad // TILE

    # Pad + cast operands (bf16 matmul operands, f32 biases).
    x_p = _pad_to(x, (n_pad, D_PAD)).astype(jnp.bfloat16).reshape(nb, TILE, D_PAD)
    a_p = _pad_to(a_norm, (n_pad, n_pad)).astype(jnp.bfloat16)

    wl = jnp.stack([_pad_to(w, (D_PAD, D_PAD)) for (w, _, _) in params["convs"]]
                   ).astype(jnp.bfloat16)
    wr = jnp.stack([_pad_to(w, (D_PAD, D_PAD)) for (_, w, _) in params["convs"]]
                   ).astype(jnp.bfloat16)
    b = jnp.stack([_pad_to(bb, (1, D_PAD)) for (_, _, bb) in params["convs"]])

    w1, b1 = params["post1"]
    w2, b2 = params["post2"]
    w1_p = _pad_to(w1, (D_PAD, D_PAD)).astype(jnp.bfloat16)
    b1_p = _pad_to(b1, (1, D_PAD))
    w2_p = _pad_to(w2, (D_PAD, OUT_PAD)).astype(jnp.bfloat16)
    b2_p = jnp.full((1, OUT_PAD), NEG_INF, jnp.float32).at[:, :out_dim].set(b2)

    # Advisory cost estimate so XLA schedules surrounding ops around this call.
    flops = (2 * num_layers * n_pad * n_pad * D_PAD
             + 2 * num_layers * n_pad * D_PAD * D_PAD * 2
             + 2 * n_pad * D_PAD * D_PAD
             + 2 * n_pad * D_PAD * OUT_PAD)
    transcendentals = num_layers * n_pad + n_pad * (OUT_PAD + 1)
    bytes_accessed = (num_layers * n_pad * n_pad * 2       # A re-streamed per layer
                      + n_pad * D_PAD * 2                  # x in
                      + n_pad * OUT_PAD * 4                # out
                      + 2 * num_layers * D_PAD * D_PAD * 2
                      + num_layers * D_PAD * 4
                      + D_PAD * D_PAD * 2 + D_PAD * 4
                      + D_PAD * OUT_PAD * 2 + OUT_PAD * 4)

    kernel = functools.partial(fused_gnn_kernel, nb=nb, tile=TILE)

    out_padded = pl.pallas_call(
        kernel,
        out_shape=jax.ShapeDtypeStruct((n_pad, OUT_PAD), jnp.float32),
        grid_spec=pltpu.PrefetchScalarGridSpec(
            num_scalar_prefetch=0,
            grid=(num_layers, nb, nb),
            in_specs=[
                # input features: single block, resident for the whole kernel
                pl.BlockSpec((nb, TILE, D_PAD), lambda l, i, k: (0, 0, 0)),
                # adjacency tile (the only O(N^2) operand), pipelined per step
                pl.BlockSpec((TILE, TILE), lambda l, i, k: (i, k)),
                # per-layer SAGE weights: DMA'd once per layer, then resident
                pl.BlockSpec((1, D_PAD, D_PAD), lambda l, i, k: (l, 0, 0)),
                pl.BlockSpec((1, D_PAD, D_PAD), lambda l, i, k: (l, 0, 0)),
                pl.BlockSpec((1, 1, D_PAD), lambda l, i, k: (l, 0, 0)),
                # post_mp params: resident for the whole kernel
                pl.BlockSpec((D_PAD, D_PAD), lambda l, i, k: (0, 0)),
                pl.BlockSpec((1, D_PAD), lambda l, i, k: (0, 0)),
                pl.BlockSpec((D_PAD, OUT_PAD), lambda l, i, k: (0, 0)),
                pl.BlockSpec((1, OUT_PAD), lambda l, i, k: (0, 0)),
            ],
            # full output resident in VMEM; single HBM writeback at the end
            out_specs=pl.BlockSpec((n_pad, OUT_PAD), lambda l, i, k: (0, 0)),
            scratch_shapes=[
                pltpu.VMEM((TILE, D_PAD), jnp.float32),            # A@X accumulator
                pltpu.VMEM((2 * nb, TILE, D_PAD), jnp.bfloat16),   # ping-pong activations
            ],
        ),
        compiler_params=pltpu.CompilerParams(
            # row axis is NOT parallel: cross-layer dependency through the
            # VMEM-resident activation scratch.
            dimension_semantics=("arbitrary", "arbitrary", "arbitrary")),
        cost_estimate=pl.CostEstimate(flops=flops,
                                      transcendentals=transcendentals,
                                      bytes_accessed=bytes_accessed),
    )(x_p, a_p, wl, wr, b, w1_p, b1_p, w2_p, b2_p)

    return out_padded[:n, :out_dim]


# ----------------------------------------------------------------------------
# Parameter setup + pure-JAX reference (plain JAX, outside the kernel)
# ----------------------------------------------------------------------------
def init_linear(key, fan_in, fan_out):
    """Deterministic PyTorch-Linear-style init; weight stored as [in, out]."""
    kw, kb = jax.random.split(key)
    bound = 1.0 / jnp.sqrt(float(fan_in))
    w = jax.random.uniform(kw, (fan_in, fan_out), jnp.float32, -bound, bound)
    b = jax.random.uniform(kb, (1, fan_out), jnp.float32, -bound, bound)
    return w, b


def build_gnn_params(key, input_dim, hidden_dim, output_dim, num_layers, heads=1):
    params = {"convs": []}
    in_dim = input_dim
    for _ in range(num_layers):
        key, k1, k2 = jax.random.split(key, 3)
        wl, bl = init_linear(k1, in_dim, hidden_dim)
        wr, br = init_linear(k2, in_dim, hidden_dim)
        params["convs"].append((wl, wr, bl + br))  # lin_l/lin_r biases fuse additively
        in_dim = heads * hidden_dim
    key, k1, k2 = jax.random.split(key, 3)
    params["post1"] = init_linear(k1, heads * hidden_dim, hidden_dim)
    params["post2"] = init_linear(k2, hidden_dim, output_dim)
    return params


def edge_index_to_mean_adj(edge_index, num_nodes):
    """A_norm[i, j] = 1/deg_in(i) for each edge j->i (PyG 'mean' aggregation)."""
    # TODO(synk): for large sparse graphs replace the dense O(N^2) A_norm with a
    # CSR gather aggregation (scalar-prefetch neighbor table + manual DMA).
    src, dst = edge_index[0], edge_index[1]
    adj = jnp.zeros((num_nodes, num_nodes), jnp.float32)
    adj = adj.at[dst, src].add(1.0)
    deg = jnp.sum(adj, axis=1, keepdims=True)
    return adj / jnp.maximum(deg, 1.0)


def gnn_stack_reference(x, a_norm, params):
    """Pure-JAX f32 reference for correctness checking."""
    h = x
    for wl, wr, b in params["convs"]:
        z = h @ wl + (a_norm @ h) @ wr + b
        nrm = jnp.sqrt(jnp.sum(z * z, axis=-1, keepdims=True))
        z = z / jnp.maximum(nrm, 1e-12)
        h = jnp.maximum(z, 0.0)
    w1, b1 = params["post1"]
    w2, b2 = params["post2"]
    logits = (h @ w1 + b1) @ w2 + b2
    return jax.nn.log_softmax(logits, axis=1)


# ----------------------------------------------------------------------------
if __name__ == "__main__":
    N_NODES = 256
    N_EDGES = 1024
    INPUT_DIM = 16
    HIDDEN_DIM = 32
    OUTPUT_DIM = 8
    NUM_LAYERS = 2
    HEADS = 1  # args.heads

    key = jax.random.PRNGKey(0)
    kx, ke1, ke2, kp = jax.random.split(key, 4)

    x = jax.random.normal(kx, (N_NODES, INPUT_DIM), jnp.float32)
    edge_index = jnp.stack(
        [
            jax.random.randint(ke1, (N_EDGES,), 0, N_NODES),
            jax.random.randint(ke2, (N_EDGES,), 0, N_NODES),
        ],
        axis=0,
    )
    a_norm = edge_index_to_mean_adj(edge_index, N_NODES)

    params = build_gnn_params(kp, INPUT_DIM, HIDDEN_DIM, OUTPUT_DIM, NUM_LAYERS, HEADS)

    out = gnn_stack_forward(x, a_norm, params)
    out = jax.block_until_ready(out)

    assert out.shape == (N_NODES, OUTPUT_DIM)
    # rows of exp(log_softmax) must sum to 1
    assert jnp.allclose(jnp.sum(jnp.exp(out), axis=1), 1.0, atol=1e-3)
    # bf16 matmuls with f32 accumulation -> loose tolerance vs f32 reference
    ref = gnn_stack_reference(x, a_norm, params)
    assert float(jnp.max(jnp.abs(out - ref))) < 0.15
    print("KERNEL_OK")
</pallas_src>

<mosaic_0001>
module attributes {stable_mosaic.version = 11 : i64} {
  func.func @fused_gnn_kernel(%arg0: i32, %arg1: i32, %arg2: i32, %arg3: memref<2x128x128xbf16, #tpu.memory_space<vmem>>, %arg4: memref<128x128xbf16, #tpu.memory_space<vmem>>, %arg5: memref<1x128x128xbf16, #tpu.memory_space<vmem>>, %arg6: memref<1x128x128xbf16, #tpu.memory_space<vmem>>, %arg7: memref<1x1x128xf32, #tpu.memory_space<vmem>>, %arg8: memref<128x128xbf16, #tpu.memory_space<vmem>>, %arg9: memref<1x128xf32, #tpu.memory_space<vmem>>, %arg10: memref<128x128xbf16, #tpu.memory_space<vmem>>, %arg11: memref<1x128xf32, #tpu.memory_space<vmem>>, %arg12: memref<256x128xf32, #tpu.memory_space<vmem>>, %arg13: memref<128x128xf32, #tpu.memory_space<vmem>>, %arg14: memref<4x128x128xbf16, #tpu.memory_space<vmem>>) attributes {dimension_semantics = [#tpu.dimension_semantics<arbitrary>, #tpu.dimension_semantics<arbitrary>, #tpu.dimension_semantics<arbitrary>], iteration_bounds = array<i64: 2, 2, 2>, scalar_prefetch = 0 : i64, scratch_operands = 2 : i64, tpu.core_type = #tpu.core_type<tc>, window_params = [{pipeline_mode = #tpu.pipeline_mode<synchronous>, transform_indices = @transform_0, window_bounds = array<i64: 2, 128, 128>}, {transform_indices = @transform_1, window_bounds = array<i64: 128, 128>}, {transform_indices = @transform_2, window_bounds = array<i64: 1, 128, 128>}, {transform_indices = @transform_3, window_bounds = array<i64: 1, 128, 128>}, {transform_indices = @transform_4, window_bounds = array<i64: 1, 1, 128>}, {pipeline_mode = #tpu.pipeline_mode<synchronous>, transform_indices = @transform_5, window_bounds = array<i64: 128, 128>}, {pipeline_mode = #tpu.pipeline_mode<synchronous>, transform_indices = @transform_6, window_bounds = array<i64: 1, 128>}, {pipeline_mode = #tpu.pipeline_mode<synchronous>, transform_indices = @transform_7, window_bounds = array<i64: 128, 128>}, {pipeline_mode = #tpu.pipeline_mode<synchronous>, transform_indices = @transform_8, window_bounds = array<i64: 1, 128>}, {pipeline_mode = #tpu.pipeline_mode<synchronous>, transform_indices = @transform_9, window_bounds = array<i64: 256, 128>}]} {
    %c0_i32 = arith.constant 0 : i32
    %0 = arith.cmpi eq, %arg0, %c0_i32 : i32
    %c0_i32_0 = arith.constant 0 : i32
    %1 = arith.cmpi eq, %arg1, %c0_i32_0 : i32
    %2 = arith.andi %0, %1 : i1
    %c0_i32_1 = arith.constant 0 : i32
    %3 = arith.cmpi eq, %arg2, %c0_i32_1 : i32
    %4 = arith.andi %2, %3 : i1
    %5 = arith.extui %4 : i1 to i32
    %c0_i32_2 = arith.constant 0 : i32
    %6 = arith.cmpi ne, %5, %c0_i32_2 : i32
    scf.if %6 {
      %c0_20 = arith.constant 0 : index
      %c0_21 = arith.constant 0 : index
      %c0_22 = arith.constant 0 : index
      %34 = vector.load %arg3[%c0_20, %c0_21, %c0_22] : memref<2x128x128xbf16, #tpu.memory_space<vmem>>, vector<2x128x128xbf16>
      %c2 = arith.constant 2 : index
      %c0_23 = arith.constant 0 : index
      %c0_24 = arith.constant 0 : index
      %35 = vector.load %arg14[%c2, %c0_23, %c0_24] : memref<4x128x128xbf16, #tpu.memory_space<vmem>>, vector<2x128x128xbf16>
      tpu.vector_store %arg14[%c2, %c0_23, %c0_24], %34 {strides = array<i32>} : memref<4x128x128xbf16, #tpu.memory_space<vmem>>, vector<2x128x128xbf16>,
    } else {
    }
    %c0_i32_3 = arith.constant 0 : i32
    %7 = arith.cmpi eq, %arg2, %c0_i32_3 : i32
    %8 = arith.extui %7 : i1 to i32
    %c0_i32_4 = arith.constant 0 : i32
    %9 = arith.cmpi ne, %8, %c0_i32_4 : i32
    scf.if %9 {
      %cst_20 = arith.constant 0.000000e+00 : f32
      %34 = vector.broadcast %cst_20 : f32 to vector<128x128xf32>
      %c0_21 = arith.constant 0 : index
      %c0_22 = arith.constant 0 : index
      %35 = vector.load %arg13[%c0_21, %c0_22] : memref<128x128xf32, #tpu.memory_space<vmem>>, vector<128x128xf32>
      tpu.vector_store %arg13[%c0_21, %c0_22], %34 {strides = array<i32>} : memref<128x128xf32, #tpu.memory_space<vmem>>, vector<128x128xf32>,
    } else {
    }
    %c1_i32 = arith.constant 1 : i32
    %10 = arith.addi %arg0, %c1_i32 : i32
    %c2_i32 = arith.constant 2 : i32
    %c0_i32_5 = arith.constant 0 : i32
    %11 = arith.cmpi eq, %c2_i32, %c0_i32_5 : i32
    %c1_i32_6 = arith.constant 1 : i32
    %12 = arith.select %11, %c1_i32_6, %c2_i32 : i32
    %13 = arith.remsi %10, %12 : i32
    %c0_i32_7 = arith.constant 0 : i32
    %14 = arith.cmpi ne, %13, %c0_i32_7 : i32
    %c0_i32_8 = arith.constant 0 : i32
    %15 = arith.cmpi slt, %13, %c0_i32_8 : i32
    %c0_i32_9 = arith.constant 0 : i32
    %16 = arith.cmpi slt, %12, %c0_i32_9 : i32
    %17 = arith.xori %15, %16 : i1
    %18 = arith.andi %17, %14 : i1
    %19 = arith.addi %13, %12 : i32
    %20 = arith.select %18, %19, %13 : i32
    %c2_i32_10 = arith.constant 2 : i32
    %21 = arith.muli %20, %c2_i32_10 : i32
    %c0 = arith.constant 0 : index
    %c0_11 = arith.constant 0 : index
    %22 = vector.load %arg13[%c0, %c0_11] : memref<128x128xf32, #tpu.memory_space<vmem>>, vector<128x128xf32>
    %c0_12 = arith.constant 0 : index
    %c0_13 = arith.constant 0 : index
    %23 = vector.load %arg4[%c0_12, %c0_13] : memref<128x128xbf16, #tpu.memory_space<vmem>>, vector<128x128xbf16>
    %24 = arith.addi %21, %arg2 : i32
    %25 = arith.index_cast %24 : i32 to index
    %c0_14 = arith.constant 0 : index
    %c0_15 = arith.constant 0 : index
    %26 = vector.load %arg14[%25, %c0_14, %c0_15] : memref<4x128x128xbf16, #tpu.memory_space<vmem>>, vector<1x128x128xbf16>
    %27 = vector.shape_cast %26 : vector<1x128x128xbf16> to vector<128x128xbf16>
    %cst = arith.constant dense<0.000000e+00> : vector<128x128xf32>
    %28 = tpu.matmul %23, %27, %cst {dimension_numbers = #tpu.dot_dimension_numbers<[1], [0], [0], [1], [0, 0, 1, 1], [], []>} : vector<128x128xbf16>, vector<128x128xbf16>, vector<128x128xf32> -> vector<128x128xf32>
    %29 = arith.addf %22, %28 : vector<128x128xf32>
    %c0_16 = arith.constant 0 : index
    %c0_17 = arith.constant 0 : index
    %30 = vector.load %arg13[%c0_16, %c0_17] : memref<128x128xf32, #tpu.memory_space<vmem>>, vector<128x128xf32>
    tpu.vector_store %arg13[%c0_16, %c0_17], %29 {strides = array<i32>} : memref<128x128xf32, #tpu.memory_space<vmem>>, vector<128x128xf32>,
    %c1_i32_18 = arith.constant 1 : i32
    %31 = arith.cmpi eq, %arg2, %c1_i32_18 : i32
    %32 = arith.extui %31 : i1 to i32
    %c0_i32_19 = arith.constant 0 : i32
    %33 = arith.cmpi ne, %32, %c0_i32_19 : i32
    scf.if %33 {
      %34 = arith.addi %21, %arg1 : i32
      %35 = arith.index_cast %34 : i32 to index
      %c0_20 = arith.constant 0 : index
      %c0_21 = arith.constant 0 : index
      %36 = vector.load %arg14[%35, %c0_20, %c0_21] : memref<4x128x128xbf16, #tpu.memory_space<vmem>>, vector<1x128x128xbf16>
      %37 = vector.shape_cast %36 : vector<1x128x128xbf16> to vector<128x128xbf16>
      %c0_22 = arith.constant 0 : index
      %c0_23 = arith.constant 0 : index
      %c0_24 = arith.constant 0 : index
      %38 = vector.load %arg5[%c0_22, %c0_23, %c0_24] : memref<1x128x128xbf16, #tpu.memory_space<vmem>>, vector<1x128x128xbf16>
      %39 = vector.shape_cast %38 : vector<1x128x128xbf16> to vector<128x128xbf16>
      %cst_25 = arith.constant dense<0.000000e+00> : vector<128x128xf32>
      %40 = tpu.matmul %37, %39, %cst_25 {dimension_numbers = #tpu.dot_dimension_numbers<[1], [0], [0], [1], [0, 0, 1, 1], [], []>} : vector<128x128xbf16>, vector<128x128xbf16>, vector<128x128xf32> -> vector<128x128xf32>
      %c0_26 = arith.constant 0 : index
      %c0_27 = arith.constant 0 : index
      %41 = vector.load %arg13[%c0_26, %c0_27] : memref<128x128xf32, #tpu.memory_space<vmem>>, vector<128x128xf32>
      %42 = arith.truncf %41 : vector<128x128xf32> to vector<128x128xbf16>
      %c0_28 = arith.constant 0 : index
      %c0_29 = arith.constant 0 : index
      %c0_30 = arith.constant 0 : index
      %43 = vector.load %arg6[%c0_28, %c0_29, %c0_30] : memref<1x128x128xbf16, #tpu.memory_space<vmem>>, vector<1x128x128xbf16>
      %44 = vector.shape_cast %43 : vector<1x128x128xbf16> to vector<128x128xbf16>
      %cst_31 = arith.constant dense<0.000000e+00> : vector<128x128xf32>
      %45 = tpu.matmul %42, %44, %cst_31 {dimension_numbers = #tpu.dot_dimension_numbers<[1], [0], [0], [1], [0, 0, 1, 1], [], []>} : vector<128x128xbf16>, vector<128x128xbf16>, vector<128x128xf32> -> vector<128x128xf32>
      %46 = arith.addf %40, %45 : vector<128x128xf32>
      %c0_32 = arith.constant 0 : index
      %c0_33 = arith.constant 0 : index
      %c0_34 = arith.constant 0 : index
      %47 = vector.load %arg7[%c0_32, %c0_33, %c0_34] : memref<1x1x128xf32, #tpu.memory_space<vmem>>, vector<1x1x128xf32>
      %48 = vector.shape_cast %47 : vector<1x1x128xf32> to vector<1x128xf32>
      %49 = vector.broadcast %48 : vector<1x128xf32> to vector<128x128xf32>
      %50 = arith.addf %46, %49 : vector<128x128xf32>
      %51 = arith.mulf %50, %50 : vector<128x128xf32>
      %cst_35 = arith.constant dense<0.000000e+00> : vector<128xf32>
      %52 = vector.multi_reduction <add>, %51, %cst_35 [1] : vector<128x128xf32> to vector<128xf32>
      %53 = vector.shape_cast %52 : vector<128xf32> to vector<128x1xf32>
      %cst_36 = arith.constant 1.000000e-24 : f32
      %54 = vector.broadcast %cst_36 : f32 to vector<128x1xf32>
      %55 = arith.maximumf %53, %54 : vector<128x1xf32>
      %56 = math.rsqrt %55 : vector<128x1xf32>
      %57 = vector.broadcast %56 : vector<128x1xf32> to vector<128x128xf32>
      %58 = arith.mulf %50, %57 : vector<128x128xf32>
      %cst_37 = arith.constant 0.000000e+00 : f32
      %59 = vector.broadcast %cst_37 : f32 to vector<128x128xf32>
      %60 = arith.maximumf %58, %59 : vector<128x128xf32>
      %61 = arith.truncf %60 : vector<128x128xf32> to vector<128x128xbf16>
      %c2_i32_38 = arith.constant 2 : i32
      %c0_i32_39 = arith.constant 0 : i32
      %62 = arith.cmpi eq, %c2_i32_38, %c0_i32_39 : i32
      %c1_i32_40 = arith.constant 1 : i32
      %63 = arith.select %62, %c1_i32_40, %c2_i32_38 : i32
      %64 = arith.remsi %arg0, %63 : i32
      %c0_i32_41 = arith.constant 0 : i32
      %65 = arith.cmpi ne, %64, %c0_i32_41 : i32
      %c0_i32_42 = arith.constant 0 : i32
      %66 = arith.cmpi slt, %64, %c0_i32_42 : i32
      %c0_i32_43 = arith.constant 0 : i32
      %67 = arith.cmpi slt, %63, %c0_i32_43 : i32
      %68 = arith.xori %66, %67 : i1
      %69 = arith.andi %68, %65 : i1
      %70 = arith.addi %64, %63 : i32
      %71 = arith.select %69, %70, %64 : i32
      %c2_i32_44 = arith.constant 2 : i32
      %72 = arith.muli %71, %c2_i32_44 : i32
      %73 = arith.addi %72, %arg1 : i32
      %74 = arith.index_cast %73 : i32 to index
      %c0_45 = arith.constant 0 : index
      %c0_46 = arith.constant 0 : index
      %75 = vector.load %arg14[%74, %c0_45, %c0_46] : memref<4x128x128xbf16, #tpu.memory_space<vmem>>, vector<1x128x128xbf16>
      %76 = vector.shape_cast %75 : vector<1x128x128xbf16> to vector<128x128xbf16>
      %77 = vector.shape_cast %61 : vector<128x128xbf16> to vector<1x128x128xbf16>
      tpu.vector_store %arg14[%74, %c0_45, %c0_46], %77 {strides = array<i32>} : memref<4x128x128xbf16, #tpu.memory_space<vmem>>, vector<1x128x128xbf16>,
      %c1_i32_47 = arith.constant 1 : i32
      %78 = arith.cmpi eq, %arg0, %c1_i32_47 : i32
      %79 = arith.extui %78 : i1 to i32
      %c0_i32_48 = arith.constant 0 : i32
      %80 = arith.cmpi ne, %79, %c0_i32_48 : i32
      scf.if %80 {
        %81 = arith.truncf %60 : vector<128x128xf32> to vector<128x128xbf16>
        %c0_49 = arith.constant 0 : index
        %c0_50 = arith.constant 0 : index
        %82 = vector.load %arg8[%c0_49, %c0_50] : memref<128x128xbf16, #tpu.memory_space<vmem>>, vector<128x128xbf16>
        %cst_51 = arith.constant dense<0.000000e+00> : vector<128x128xf32>
        %83 = tpu.matmul %81, %82, %cst_51 {dimension_numbers = #tpu.dot_dimension_numbers<[1], [0], [0], [1], [0, 0, 1, 1], [], []>} : vector<128x128xbf16>, vector<128x128xbf16>, vector<128x128xf32> -> vector<128x128xf32>
        %c0_52 = arith.constant 0 : index
        %c0_53 = arith.constant 0 : index
        %84 = vector.load %arg9[%c0_52, %c0_53] : memref<1x128xf32, #tpu.memory_space<vmem>>, vector<1x128xf32>
        %85 = vector.broadcast %84 : vector<1x128xf32> to vector<128x128xf32>
        %86 = arith.addf %83, %85 : vector<128x128xf32>
        %87 = arith.truncf %86 : vector<128x128xf32> to vector<128x128xbf16>
        %c0_54 = arith.constant 0 : index
        %c0_55 = arith.constant 0 : index
        %88 = vector.load %arg10[%c0_54, %c0_55] : memref<128x128xbf16, #tpu.memory_space<vmem>>, vector<128x128xbf16>
        %cst_56 = arith.constant dense<0.000000e+00> : vector<128x128xf32>
        %89 = tpu.matmul %87, %88, %cst_56 {dimension_numbers = #tpu.dot_dimension_numbers<[1], [0], [0], [1], [0, 0, 1, 1], [], []>} : vector<128x128xbf16>, vector<128x128xbf16>, vector<128x128xf32> -> vector<128x128xf32>
        %c0_57 = arith.constant 0 : index
        %c0_58 = arith.constant 0 : index
        %90 = vector.load %arg11[%c0_57, %c0_58] : memref<1x128xf32, #tpu.memory_space<vmem>>, vector<1x128xf32>
        %91 = vector.broadcast %90 : vector<1x128xf32> to vector<128x128xf32>
        %92 = arith.addf %89, %91 : vector<128x128xf32>
        %cst_59 = arith.constant dense<0xFF800000> : vector<128xf32>
        %93 = vector.multi_reduction <maximumf>, %92, %cst_59 [1] : vector<128x128xf32> to vector<128xf32>
        %94 = vector.shape_cast %93 : vector<128xf32> to vector<128x1xf32>
        %95 = vector.broadcast %94 : vector<128x1xf32> to vector<128x128xf32>
        %96 = arith.subf %92, %95 : vector<128x128xf32>
        %97 = math.exp %96 : vector<128x128xf32>
        %cst_60 = arith.constant dense<0.000000e+00> : vector<128xf32>
        %98 = vector.multi_reduction <add>, %97, %cst_60 [1] : vector<128x128xf32> to vector<128xf32>
        %99 = vector.shape_cast %98 : vector<128xf32> to vector<128x1xf32>
        %100 = math.log %99 : vector<128x1xf32>
        %101 = arith.addf %100, %94 : vector<128x1xf32>
        %c128_i32 = arith.constant 128 : i32
        %102 = arith.muli %arg1, %c128_i32 : i32
        %103 = tpu.assume_multiple %102, 128 : i32
        %104 = vector.broadcast %101 : vector<128x1xf32> to vector<128x128xf32>
        %105 = arith.subf %92, %104 : vector<128x128xf32>
        %106 = arith.index_cast %103 : i32 to index
        %c0_61 = arith.constant 0 : index
        %107 = vector.load %arg12[%106, %c0_61] : memref<256x128xf32, #tpu.memory_space<vmem>>, vector<128x128xf32>
        tpu.vector_store %arg12[%106, %c0_61], %105 {strides = array<i32>} : memref<256x128xf32, #tpu.memory_space<vmem>>, vector<128x128xf32>,
      } else {
      }
    } else {
    }
    return
  }
  func.func @transform_0(%arg0: i32, %arg1: i32, %arg2: i32) -> (i32, i32, i32) {
    %c0_i32 = arith.constant 0 : i32
    %c0_i32_0 = arith.constant 0 : i32
    %c0_i32_1 = arith.constant 0 : i32
    %c0_i32_2 = arith.constant 0 : i32
    return %c0_i32, %c0_i32_0, %c0_i32_1 : i32, i32, i32
  }
  func.func @transform_1(%arg0: i32, %arg1: i32, %arg2: i32) -> (i32, i32) {
    %c0_i32 = arith.constant 0 : i32
    return %arg1, %arg2 : i32, i32
  }
  func.func @transform_2(%arg0: i32, %arg1: i32, %arg2: i32) -> (i32, i32, i32) {
    %c0_i32 = arith.constant 0 : i32
    %c0_i32_0 = arith.constant 0 : i32
    %c0_i32_1 = arith.constant 0 : i32
    return %arg0, %c0_i32, %c0_i32_0 : i32, i32, i32
  }
  func.func @transform_3(%arg0: i32, %arg1: i32, %arg2: i32) -> (i32, i32, i32) {
    %c0_i32 = arith.constant 0 : i32
    %c0_i32_0 = arith.constant 0 : i32
    %c0_i32_1 = arith.constant 0 : i32
    return %arg0, %c0_i32, %c0_i32_0 : i32, i32, i32
  }
  func.func @transform_4(%arg0: i32, %arg1: i32, %arg2: i32) -> (i32, i32, i32) {
    %c0_i32 = arith.constant 0 : i32
    %c0_i32_0 = arith.constant 0 : i32
    %c0_i32_1 = arith.constant 0 : i32
    return %arg0, %c0_i32, %c0_i32_0 : i32, i32, i32
  }
  func.func @transform_5(%arg0: i32, %arg1: i32, %arg2: i32) -> (i32, i32) {
    %c0_i32 = arith.constant 0 : i32
    %c0_i32_0 = arith.constant 0 : i32
    %c0_i32_1 = arith.constant 0 : i32
    return %c0_i32, %c0_i32_0 : i32, i32
  }
  func.func @transform_6(%arg0: i32, %arg1: i32, %arg2: i32) -> (i32, i32) {
    %c0_i32 = arith.constant 0 : i32
    %c0_i32_0 = arith.constant 0 : i32
    %c0_i32_1 = arith.constant 0 : i32
    return %c0_i32, %c0_i32_0 : i32, i32
  }
  func.func @transform_7(%arg0: i32, %arg1: i32, %arg2: i32) -> (i32, i32) {
    %c0_i32 = arith.constant 0 : i32
    %c0_i32_0 = arith.constant 0 : i32
    %c0_i32_1 = arith.constant 0 : i32
    return %c0_i32, %c0_i32_0 : i32, i32
  }
  func.func @transform_8(%arg0: i32, %arg1: i32, %arg2: i32) -> (i32, i32) {
    %c0_i32 = arith.constant 0 : i32
    %c0_i32_0 = arith.constant 0 : i32
    %c0_i32_1 = arith.constant 0 : i32
    return %c0_i32, %c0_i32_0 : i32, i32
  }
  func.func @transform_9(%arg0: i32, %arg1: i32, %arg2: i32) -> (i32, i32) {
    %c0_i32 = arith.constant 0 : i32
    %c0_i32_0 = arith.constant 0 : i32
    %c0_i32_1 = arith.constant 0 : i32
    return %c0_i32, %c0_i32_0 : i32, i32
  }
}

</mosaic_0001>

<bundles_post_ra>
// kernel: gnn_stack_forward.1
= control target key start
LH: loop header
LB: loop body
LE: loop exit
PB: predicated region body
PF: predicated region fallthrough
CT: control target
= control target key end

     0   :  { %s3408_s0 = inlined_call_operand.vmem [shape: bf16[2,128,128], index: 0, kind: input, shape index: {}]   ;;  %s3409_s1 = inlined_call_operand.vmem [shape: bf16[256,256], index: 1, kind: input, shape index: {}]   ;;  %s3410_s2 = inlined_call_operand.vmem [shape: bf16[2,128,128], index: 2, kind: input, shape index: {}]   ;;  %s3411_s3 = inlined_call_operand.vmem [shape: bf16[2,128,128], index: 3, kind: input, shape index: {}]   ;;  %s3412_s4 = inlined_call_operand.vmem [shape: f32[2,1,128], index: 4, kind: input, shape index: {}]   ;;  %s3413_s5 = inlined_call_operand.vmem [shape: bf16[128,128], index: 5, kind: input, shape index: {}]   ;;  %s3414_s6 = inlined_call_operand.vmem [shape: f32[1,128], index: 6, kind: input, shape index: {}]   ;;  %s3415_s7 = inlined_call_operand.vmem [shape: bf16[128,128], index: 7, kind: input, shape index: {}]   ;;  %s3416_s8 = inlined_call_operand.vmem [shape: f32[1,128], index: 8, kind: input, shape index: {}]   ;;  %s3417_s9 = inlined_call_operand.vmem [shape: f32[256,128], index: 9, kind: output, shape index: {}]  }
   0x1   :  { %3422 = sst [smem:[#allocation10_spill]] %s3409_s1 }
   0x2   :  { %s2797_s30 = smov 0   ;;  %s2799_s10 = smov 0  }
   0x3   :  { %s2801_s11 = smov 0   ;;  %s2803_s12 = smov 0  }
   0x4   :  { %s2805_s13 = smov 0   ;;  %s2807_s14 = smov 0  }
   0x5   :  { %s2809_s15 = smov 0   ;;  %s2811_s16 = smov 0  }
   0x6   :  { %s2813_s17 = smov 0  }
   0x7 LB: > { %3423 = sst [smem:[#allocation5_spill]] %s2736_s15  ;;  %s31_s18 = sadd.s32 1, %s2732_s14  ;;  %s2744_s17 = sphi %s2813_s17, %s19_s17   ;;  %s2740_s16 = sphi %s2811_s16, %s3438_s16   ;;  %s2736_s15 = sphi %s2809_s15, %s3432_s15   ;;  %s2732_s14 = sphi %s2807_s14, %s3437_s14   ;;  %s2728_s13 = sphi %s2805_s13, %s3430_s13   ;;  %s2724_s12 = sphi %s2803_s12, %s3429_s12   ;;  %s2720_s11 = sphi %s2801_s11, %s3436_s11   ;;  %s2716_s10 = sphi %s2799_s10, %s3435_s10   ;;  %s2712_s30 = sphi %s2797_s30, %s3434_s30  }
   0x8   : > { %3424 = sst [smem:[#allocation6_spill]] %s2740_s16  ;;  %p32_p0 = scmp.ge.s32.totalorder %s31_s18, 2 }
   0x9   : > { %s34_s19 = sadd.s32 1, %s2736_s15  ;;  %p75_p1 = scmp.ne.s32.totalorder %s2716_s10, %s2712_s30 }
   0xa   : > { %s3440_s18 = smov (%p32_p0, %s31_s18), 0  ;;  %s3442_s19 = smov (!%p32_p0, %s34_s19), %s2736_s15 }
   0xb   : > { %3425 = sst [smem:[#allocation7_spill]] %s3440_s18  ;;  %p76_p2 = scmp.eq.s32.totalorder %s2744_s17, 0 }
   0xc   : > { %p36_p3 = scmp.ge.s32.totalorder %s3442_s19, 2  ;;  %s38_s20 = sadd.s32 1, %s2740_s16 }
   0xd   : > { %s64_s21 = ssub.s32 %s2732_s14, %s3440_s18  ;;  %p77_p4 = por %p76_p2, %p75_p1 }
   0xe   : > { %s3444_s19 = smov (%p36_p3, %s3442_s19), 0  ;;  %s3446_s20 = smov (!%p36_p3, %s38_s20), %s2740_s16 }
   0xf   : > { %3426 = sst [smem:[#allocation8_spill]] %s3444_s19  ;;  %s63_s22 = ssub.s32 %s2736_s15, %s3444_s19 }
  0x10   : > { %s68_s23 = sadd.s32 1, %s2716_s10  ;;  %p40_p5 = scmp.ge.s32.totalorder %s3446_s20, 2 }
  0x11   : > { %s65_s24 = sor.u32 %s64_s21, %s63_s22  ;;  %p2081_p7 = scmp.ge.s32.totalorder %s2744_s17, 8 }
  0x12   : > { %p66_p6 = scmp.eq.s32.totalorder %s65_s24, 0  ;;  %s3448_s20 = smov (%p40_p5, %s3446_s20), 0 }
  0x13   : > { %3427 = sst [smem:[#allocation9_spill]] %s3448_s20  ;;  %299 = sbr.rel (%p2081_p7) target bundleno = 46 (0x2e), region = 36 }
  0x14   : > { %s2862_s25 = scalar_select %p66_p6, %s2716_s10, %s68_s23  }
  0x1a   : > { %302 = sbr.rel (!%p77_p4) target bundleno = 46 (0x2e), region = 40  ;;  %s304_s26 = sand.u32 (%p77_p4), 1, %s2716_s10  }
  0x1b   : > { %s2171_s27 = sshll.u32 (%p77_p4), %s2736_s15, 5  ;;  %s2082_s28 = sshll.u32 (%p77_p4), %s304_s26, 6 }
  0x1c   : > { %s309_s29 = sadd.s32 (%p77_p4), %s2732_s14, %s2171_s27  ;;  %s3428_s1 = sld [smem:[#allocation10_spill]] (%p77_p4) }
  0x1d   : > { %s2085_s19 = sshll.u32 (%p77_p4), %s309_s29, 2  ;;  %s306_s22 = scalar_lea.vmem (%p77_p4), [#allocation4], %s2082_s28 }
  0x22   : > { %s2871_s21 = scalar_lea.vmem %s3428_s1, %s2085_s19 }
  0x23   : > { %v327_v0 = vld [vmem:[%s2871_s21] sm:$0xf]  ;;  %v329_v1 = vld [vmem:[%s2871_s21 + $0x8] sm:$0xf]  ;;  %v331_v2 = vld [vmem:[%s2871_s21 + $0x10] sm:$0xf] }
  0x24   : > { %328 = vst [vmem:[%s306_s22] sm:$0xf] %v327_v0  ;;  %330 = vst [vmem:[%s306_s22 + $0x4] sm:$0xf] %v329_v1  ;;  %v333_v3 = vld [vmem:[%s2871_s21 + $0x18] sm:$0xf] }
  0x25   : > { %332 = vst [vmem:[%s306_s22 + $0x8] sm:$0xf] %v331_v2  ;;  %v335_v4 = vld [vmem:[%s2871_s21 + $0x20] sm:$0xf]  ;;  %v337_v5 = vld [vmem:[%s2871_s21 + $0x28] sm:$0xf] }
  0x26   : > { %334 = vst [vmem:[%s306_s22 + $0xc] sm:$0xf] %v333_v3  ;;  %336 = vst [vmem:[%s306_s22 + $0x10] sm:$0xf] %v335_v4  ;;  %v339_v6 = vld [vmem:[%s2871_s21 + $0x30] sm:$0xf] }
  0x27   : > { %338 = vst [vmem:[%s306_s22 + $0x14] sm:$0xf] %v337_v5  ;;  %v341_v7 = vld [vmem:[%s2871_s21 + $0x38] sm:$0xf]  ;;  %v343_v8 = vld [vmem:[%s2871_s21 + $0x40] sm:$0xf] }
  0x28   : > { %340 = vst [vmem:[%s306_s22 + $0x18] sm:$0xf] %v339_v6  ;;  %342 = vst [vmem:[%s306_s22 + $0x1c] sm:$0xf] %v341_v7  ;;  %v345_v9 = vld [vmem:[%s2871_s21 + $0x48] sm:$0xf] }
  0x29   : > { %344 = vst [vmem:[%s306_s22 + $0x20] sm:$0xf] %v343_v8  ;;  %v347_v10 = vld [vmem:[%s2871_s21 + $0x50] sm:$0xf]  ;;  %v349_v11 = vld [vmem:[%s2871_s21 + $0x58] sm:$0xf] }
  0x2a   : > { %346 = vst [vmem:[%s306_s22 + $0x24] sm:$0xf] %v345_v9  ;;  %348 = vst [vmem:[%s306_s22 + $0x28] sm:$0xf] %v347_v10  ;;  %v351_v12 = vld [vmem:[%s2871_s21 + $0x60] sm:$0xf] }
  0x2b   : > { %350 = vst [vmem:[%s306_s22 + $0x2c] sm:$0xf] %v349_v11  ;;  %v353_v13 = vld [vmem:[%s2871_s21 + $0x68] sm:$0xf]  ;;  %v355_v14 = vld [vmem:[%s2871_s21 + $0x70] sm:$0xf] }
  0x2c   : > { %352 = vst [vmem:[%s306_s22 + $0x30] sm:$0xf] %v351_v12  ;;  %354 = vst [vmem:[%s306_s22 + $0x34] sm:$0xf] %v353_v13  ;;  %v357_v15 = vld [vmem:[%s2871_s21 + $0x78] sm:$0xf] }
  0x2d   : > { %356 = vst [vmem:[%s306_s22 + $0x38] sm:$0xf] %v355_v14  ;;  %358 = vst [vmem:[%s306_s22 + $0x3c] sm:$0xf] %v357_v15 }
  0x2e PF: > { %p2086_p8 = scmp.ge.s32.totalorder %s2744_s17, 1  ;;  %p434_p9 = scmp.lt.s32.totalorder %s2744_s17, 9 }
  0x30   : > { %p435_p10 = pnand %p2086_p8, %p434_p9 }
  0x31   : > { %s441_s16 = sand.u32 (!%p435_p10), 1, %s2712_s30   ;;  %p485_p11 = scmp.lt.s32.totalorder (!%p435_p10), %s2728_s13, 1 }
  0x32   : > { %438 = sbr.rel (%p435_p10) target bundleno = 1566 (0x61e), region = 93  ;;  %s2087_s18 = sshll.u32 (!%p435_p10), %s441_s16, 6 }
  0x33   : > { %p499_p12 = scmp.eq.s32.totalorder (!%p435_p10), %s2728_s13, 0  ;;  %p500_p13 = scmp.eq.s32.totalorder (!%p435_p10), %s2724_s12, 0 }
  0x34   : > { %p503_p1 = scmp.eq.s32.totalorder (!%p435_p10), %s2720_s11, 0  ;;  %s2914_s1 = scalar_lea.vmem (!%p435_p10), [#allocation4], %s2087_s18 }
  0x35   : > { %p501_p0 = pnand (!%p435_p10), %p500_p13, %p499_p12 }
  0x37   : > { %p502_p2 = pneg (!%p435_p10), %p501_p0 }
  0x39   : > { %s2896_s19 = scalar_select %p485_p11, %s2728_s13, 1 }
  0x3a   : > { %p504_p3 = pnand %p503_p1, %p502_p2 }
  0x3b   : > { %s2172_s23 = sshll.u32 %s2896_s19, 6  ;;  %s497_s27 = scalar_lea.vmem %s3412_s4, %s2896_s19  ;;  %v2522_v16 = vld [vmem:[%s3408_s0] sm:$0xff] (!%p504_p3)   ;;  %v2523_v17 = vld [vmem:[%s3408_s0 + $0x8] sm:$0xff] (!%p504_p3)   ;;  %v2524_v18 = vld [vmem:[%s3408_s0 + $0x10] sm:$0xff] (!%p504_p3)  }
  0x3c   : > { %s2907_s21 = scalar_lea.vmem %s3410_s2, %s2172_s23  ;;  %s2912_s16 = scalar_lea.vmem %s3411_s3, %s2172_s23  ;;  %637 = vst [vmem:[#allocation3 + $0x80] sm:$0xff] (!%p504_p3), %v2522_v16  ;;  %638 = vst [vmem:[#allocation3 + $0x88] sm:$0xff] (!%p504_p3), %v2523_v17  ;;  %v2525_v19 = vld [vmem:[%s3408_s0 + $0x18] sm:$0xff] (!%p504_p3)   ;;  %v2526_v20 = vld [vmem:[%s3408_s0 + $0x20] sm:$0xff] (!%p504_p3)  }
  0x3d   : > { %507 = sbr.rel (%p504_p3) target bundleno = 68 (0x44), region = 101  ;;  %639 = vst [vmem:[#allocation3 + $0x90] sm:$0xff] (!%p504_p3), %v2524_v18  ;;  %640 = vst [vmem:[#allocation3 + $0x98] sm:$0xff] (!%p504_p3), %v2525_v19  ;;  %v2527_v21 = vld [vmem:[%s3408_s0 + $0x28] sm:$0xff] (!%p504_p3)   ;;  %v2528_v22 = vld [vmem:[%s3408_s0 + $0x30] sm:$0xff] (!%p504_p3)  }
  0x3e   : > { %641 = vst [vmem:[#allocation3 + $0xa0] sm:$0xff] (!%p504_p3), %v2526_v20  ;;  %642 = vst [vmem:[#allocation3 + $0xa8] sm:$0xff] (!%p504_p3), %v2527_v21  ;;  %v2529_v23 = vld [vmem:[%s3408_s0 + $0x38] sm:$0xff] (!%p504_p3)   ;;  %v2530_v24 = vld [vmem:[%s3408_s0 + $0x40] sm:$0xff] (!%p504_p3)  }
  0x3f   : > { %643 = vst [vmem:[#allocation3 + $0xb0] sm:$0xff] (!%p504_p3), %v2528_v22  ;;  %644 = vst [vmem:[#allocation3 + $0xb8] sm:$0xff] (!%p504_p3), %v2529_v23  ;;  %v2531_v25 = vld [vmem:[%s3408_s0 + $0x48] sm:$0xff] (!%p504_p3)   ;;  %v2532_v26 = vld [vmem:[%s3408_s0 + $0x50] sm:$0xff] (!%p504_p3)  }
  0x40   : > { %645 = vst [vmem:[#allocation3 + $0xc0] sm:$0xff] (!%p504_p3), %v2530_v24  ;;  %646 = vst [vmem:[#allocation3 + $0xc8] sm:$0xff] (!%p504_p3), %v2531_v25  ;;  %v2533_v27 = vld [vmem:[%s3408_s0 + $0x58] sm:$0xff] (!%p504_p3)   ;;  %v2534_v28 = vld [vmem:[%s3408_s0 + $0x60] sm:$0xff] (!%p504_p3)  }
  0x41   : > { %647 = vst [vmem:[#allocation3 + $0xd0] sm:$0xff] (!%p504_p3), %v2532_v26  ;;  %648 = vst [vmem:[#allocation3 + $0xd8] sm:$0xff] (!%p504_p3), %v2533_v27  ;;  %v2535_v29 = vld [vmem:[%s3408_s0 + $0x68] sm:$0xff] (!%p504_p3)   ;;  %v2536_v30 = vld [vmem:[%s3408_s0 + $0x70] sm:$0xff] (!%p504_p3)  }
  0x42   : > { %649 = vst [vmem:[#allocation3 + $0xe0] sm:$0xff] (!%p504_p3), %v2534_v28  ;;  %650 = vst [vmem:[#allocation3 + $0xe8] sm:$0xff] (!%p504_p3), %v2535_v29  ;;  %v2537_v31 = vld [vmem:[%s3408_s0 + $0x78] sm:$0xff] (!%p504_p3)  }
  0x43   : > { %651 = vst [vmem:[#allocation3 + $0xf0] sm:$0xff] (!%p504_p3), %v2536_v30  ;;  %652 = vst [vmem:[#allocation3 + $0xf8] sm:$0xff] (!%p504_p3), %v2537_v31 }
  0x44 PF: > { %p2108_p4 = scmp.ne.s32.totalorder %s2720_s11, 0 }
  0x45   : > { %v2746_v32 = vmov (!%p2108_p4), 0.0  }
  0x46   : > { %655 = sbr.rel (%p2108_p4) target bundleno = 78 (0x4e), region = 105  ;;  %656 = vst [vmem:[#allocation2] sm:$0xff] (!%p2108_p4), %v2746_v32  ;;  %657 = vst [vmem:[#allocation2 + $0x8] sm:$0xff] (!%p2108_p4), %v2746_v32 }
  0x47   : > { %658 = vst [vmem:[#allocation2 + $0x10] sm:$0xff] (!%p2108_p4), %v2746_v32  ;;  %659 = vst [vmem:[#allocation2 + $0x18] sm:$0xff] (!%p2108_p4), %v2746_v32 }
  0x48   : > { %660 = vst [vmem:[#allocation2 + $0x20] sm:$0xff] (!%p2108_p4), %v2746_v32  ;;  %661 = vst [vmem:[#allocation2 + $0x28] sm:$0xff] (!%p2108_p4), %v2746_v32 }
  0x49   : > { %662 = vst [vmem:[#allocation2 + $0x30] sm:$0xff] (!%p2108_p4), %v2746_v32  ;;  %663 = vst [vmem:[#allocation2 + $0x38] sm:$0xff] (!%p2108_p4), %v2746_v32 }
  0x4a   : > { %664 = vst [vmem:[#allocation2 + $0x40] sm:$0xff] (!%p2108_p4), %v2746_v32  ;;  %665 = vst [vmem:[#allocation2 + $0x48] sm:$0xff] (!%p2108_p4), %v2746_v32 }
  0x4b   : > { %666 = vst [vmem:[#allocation2 + $0x50] sm:$0xff] (!%p2108_p4), %v2746_v32  ;;  %667 = vst [vmem:[#allocation2 + $0x58] sm:$0xff] (!%p2108_p4), %v2746_v32 }
  0x4c   : > { %668 = vst [vmem:[#allocation2 + $0x60] sm:$0xff] (!%p2108_p4), %v2746_v32  ;;  %669 = vst [vmem:[#allocation2 + $0x68] sm:$0xff] (!%p2108_p4), %v2746_v32 }
  0x4d   : > { %670 = vst [vmem:[#allocation2 + $0x70] sm:$0xff] %v2746_v32  ;;  %671 = vst [vmem:[#allocation2 + $0x78] sm:$0xff] %v2746_v32 }
  0x4e PF: > { %s672_s24 = sadd.s32 1, %s2728_s13  ;;  %v2538_v33 = vld [vmem:[%s2914_s1] sm:$0xff]   ;;  %v2540_v43 = vld [vmem:[%s2914_s1 + $0x8] sm:$0xff]   ;;  %v2542_v45 = vld [vmem:[%s2914_s1 + $0x10] sm:$0xff]   ;;  %p2123_p7 = scmp.ne.s32.totalorder %s2720_s11, 1 }
  0x4f   : > { %p673_p5 = scmp.lt.s32.totalorder %s672_s24, 0  ;;  %s674_s26 = ssub.s32 0, %s672_s24  ;;  %2273 = vmatprep.mubr.bf16.mxu0 %v2538_v33  ;;  %v2539_v34 = vld [vmem:[%s2914_s1 + $0x20] sm:$0xff]   ;;  %v2541_v44 = vld [vmem:[%s2914_s1 + $0x28] sm:$0xff]   ;;  %v2543_v46 = vld [vmem:[%s2914_s1 + $0x30] sm:$0xff]  }
  0x50   : > { %s2109_s28 = smin.u32 %s674_s26, %s672_s24  ;;  %2281 = vmatprep.mubr.bf16.mxu1 %v2539_v34  ;;  %v2544_v47 = vld [vmem:[%s2914_s1 + $0x18] sm:$0xff]   ;;  %v688_v49 = vld [vmem:[#allocation2 + $0x10] sm:$0xff]  ;;  %v686_v51 = vld [vmem:[#allocation2] sm:$0xff]  ;;  %s1413_s19 = ssub.s32 (!%p2123_p7), 0, %s2728_s13 }
  0x51   : > { %s676_s29 = sand.u32 1, %s2109_s28   ;;  %v2545_v48 = vld [vmem:[%s2914_s1 + $0x38] sm:$0xff]   ;;  %v687_v61 = vld [vmem:[#allocation2 + $0x8] sm:$0xff]  ;;  %v692_v9 = vld [vmem:[#allocation2 + $0x30] sm:$0xff]  ;;  %p1412_p8 = scmp.lt.s32.totalorder (!%p2123_p7), %s2728_s13, 0 }
  0x52   : > { %s677_s23 = ssub.s32 0, %s676_s29  ;;  %v694_v52 = vld [vmem:[#allocation2 + $0x40] sm:$0xff]  ;;  %v689_v55 = vld [vmem:[#allocation2 + $0x18] sm:$0xff]  ;;  %v695_v62 = vld [vmem:[#allocation2 + $0x48] sm:$0xff]  ;;  %p2149_p10 = scmp.ne.s32.totalorder (!%p2123_p7), %s2728_s13, 1 }
  0x53   : > { %s3450_s23 = smov (!%p673_p5, %s677_s23), %s676_s29  ;;  %v696_v50 = vld [vmem:[#allocation2 + $0x50] sm:$0xff]  ;;  %v697_v56 = vld [vmem:[#allocation2 + $0x58] sm:$0xff]  ;;  %v690_v11 = vld [vmem:[#allocation2 + $0x20] sm:$0xff] }
  0x54   : > { %p2111_p6 = scmp.lt.s32.totalorder %s3450_s23, 0  ;;  %s683_s30 = sadd.s32 2, %s3450_s23  ;;  %v700_v10 = vld [vmem:[#allocation2 + $0x70] sm:$0xff]  ;;  %v698_v12 = vld [vmem:[#allocation2 + $0x60] sm:$0xff]  ;;  %v693_v15 = vld [vmem:[#allocation2 + $0x38] sm:$0xff] }
  0x55   : > { %v701_v16 = vld [vmem:[#allocation2 + $0x78] sm:$0xff]  ;;  %v691_v21 = vld [vmem:[#allocation2 + $0x28] sm:$0xff]  ;;  %v2546_v33 = vld [vmem:[%s2912_s16] sm:$0xff] (!%p2123_p7)  }
  0x56   : > { %s3452_s30 = smov (!%p2111_p6, %s683_s30), %s3450_s23  ;;  %v699_v22 = vld [vmem:[#allocation2 + $0x68] sm:$0xff]  ;;  %v2547_v34 = vld [vmem:[%s2907_s21] sm:$0xff] (!%p2123_p7)  }
  0x57   : > { %s2112_s18 = sshll.u32 %s3452_s30, 1 }
  0x58   : > { %s718_s22 = sadd.s32 %s2720_s11, %s2112_s18  ;;  %s911_s1 = sadd.s32 (!%p2123_p7), %s2724_s12, %s2112_s18 }
  0x59   : > { %s2174_s15 = sshll.u32 %s718_s22, 6  ;;  %s2175_s11 = sshll.u32 (!%p2123_p7), %s911_s1, 6 }
  0x5a   : > { %s2974_s20 = scalar_lea.vmem [#allocation3], %s2174_s15  ;;  %s3005_s24 = scalar_lea.vmem (!%p2123_p7), [#allocation3], %s2175_s11 }
  0x5b   : > { %v722_v35 = vld [vmem:[%s2974_s20] sm:$0xff]  ;;  %v723_v36 = vld [vmem:[%s2974_s20 + $0x8] sm:$0xff]  ;;  %v724_v37 = vld [vmem:[%s2974_s20 + $0x10] sm:$0xff] }
  0x5c   : > { %2257 = vmatprep.subr.bf16.mxu0 %v722_v35  ;;  %2417 = vmatprep.subr.bf16.mxu1 %v722_v35  ;;  %v725_v38 = vld [vmem:[%s2974_s20 + $0x18] sm:$0xff]  ;;  %v726_v39 = vld [vmem:[%s2974_s20 + $0x20] sm:$0xff]  ;;  %v727_v40 = vld [vmem:[%s2974_s20 + $0x28] sm:$0xff] }
  0x5d   : > { %2258 = vmatpush3.bf16.msra.mxu0 %v722_v35  ;;  %2425 = vmatpush3.bf16.msra.mxu1 %v722_v35  ;;  %v728_v41 = vld [vmem:[%s2974_s20 + $0x30] sm:$0xff]  ;;  %v729_v42 = vld [vmem:[%s2974_s20 + $0x38] sm:$0xff]  ;;  %v2548_v35 = vld [vmem:[%s2912_s16 + $0x8] sm:$0xff] (!%p2123_p7)  }
  0x5e   : > { %2259 = vmatprep.subr.bf16.mxu0 %v723_v36  ;;  %2418 = vmatprep.subr.bf16.mxu1 %v723_v36 }
  0x61   : > { %2260 = vmatpush3.bf16.msra.mxu0 %v723_v36  ;;  %2426 = vmatpush3.bf16.msra.mxu1 %v723_v36  ;;  %v2549_v36 = vld [vmem:[%s2907_s21 + $0x8] sm:$0xff] (!%p2123_p7)  }
  0x62   : > { %2261 = vmatprep.subr.bf16.mxu0 %v724_v37  ;;  %2419 = vmatprep.subr.bf16.mxu1 %v724_v37 }
  0x65   : > { %2262 = vmatpush3.bf16.msra.mxu0 %v724_v37  ;;  %2427 = vmatpush3.bf16.msra.mxu1 %v724_v37  ;;  %v2550_v37 = vld [vmem:[%s2912_s16 + $0x10] sm:$0xff] (!%p2123_p7)  }
  0x66   : > { %2263 = vmatprep.subr.bf16.mxu0 %v725_v38  ;;  %2420 = vmatprep.subr.bf16.mxu1 %v725_v38 }
  0x69   : > { %2264 = vmatpush3.bf16.msra.mxu0 %v725_v38  ;;  %2428 = vmatpush3.bf16.msra.mxu1 %v725_v38  ;;  %v2551_v38 = vld [vmem:[%s2907_s21 + $0x10] sm:$0xff] (!%p2123_p7)  }
  0x6a   : > { %2265 = vmatprep.subr.bf16.mxu0 %v726_v39  ;;  %2421 = vmatprep.subr.bf16.mxu1 %v726_v39 }
  0x6d   : > { %2266 = vmatpush3.bf16.msra.mxu0 %v726_v39  ;;  %2429 = vmatpush3.bf16.msra.mxu1 %v726_v39  ;;  %v2552_v39 = vld [vmem:[%s2912_s16 + $0x18] sm:$0xff] (!%p2123_p7)  }
  0x6e   : > { %2267 = vmatprep.subr.bf16.mxu0 %v727_v40  ;;  %2422 = vmatprep.subr.bf16.mxu1 %v727_v40 }
  0x71   : > { %2268 = vmatpush3.bf16.msra.mxu0 %v727_v40  ;;  %2430 = vmatpush3.bf16.msra.mxu1 %v727_v40  ;;  %v2553_v40 = vld [vmem:[%s2907_s21 + $0x18] sm:$0xff] (!%p2123_p7)  }
  0x72   : > { %2269 = vmatprep.subr.bf16.mxu0 %v728_v41  ;;  %2423 = vmatprep.subr.bf16.mxu1 %v728_v41 }
  0x75   : > { %2270 = vmatpush3.bf16.msra.mxu0 %v728_v41  ;;  %2431 = vmatpush3.bf16.msra.mxu1 %v728_v41  ;;  %v2554_v41 = vld [vmem:[%s2912_s16 + $0x20] sm:$0xff] (!%p2123_p7)  }
  0x76   : > { %2271 = vmatprep.subr.bf16.mxu0 %v729_v42  ;;  %2424 = vmatprep.subr.bf16.mxu1 %v729_v42 }
  0x79   : > { %2272 = vmatpush3.bf16.msra.mxu0 %v729_v42  ;;  %2432 = vmatpush3.bf16.msra.mxu1 %v729_v42  ;;  %v2555_v42 = vld [vmem:[%s2907_s21 + $0x20] sm:$0xff] (!%p2123_p7)  }
  0x7a   : > { %2289 = vmatprep.subr.bf16.mxu1 (!%p2123_p7), %v2546_v33  ;;  %2321 = vmatprep.subr.bf16.mxu0 (!%p2123_p7), %v2547_v34 }
  0x7c   : > { %2274 = vmatmul.mubr.bf16.vlgmr.msra.gmra.mrb[0].mxu0 %v2540_v43  ;;  %2282 = vmatmul.mubr.bf16.vlgmr.msra.gmra.mrb[0].mxu1 %v2541_v44  ;;  %v2556_v43 = vld [vmem:[%s2912_s16 + $0x28] sm:$0xff] (!%p2123_p7)  }
  0x7d   : > { %2277 = vmatprep.mubr.bf16.mxu0 %v2542_v45  ;;  %2285 = vmatprep.mubr.bf16.mxu1 %v2543_v46  ;;  %v915_v46 = vld [vmem:[%s3005_s24] sm:$0xff] (!%p2123_p7) }
  0x7e   : > { %2290 = vmatpush3.bf16.msra.mxu1 (!%p2123_p7), %v2546_v33  ;;  %2322 = vmatpush3.bf16.msra.mxu0 (!%p2123_p7), %v2547_v34 }
  0x7f   : > { %2291 = vmatprep.subr.bf16.mxu1 (!%p2123_p7), %v2548_v35  ;;  %2323 = vmatprep.subr.bf16.mxu0 (!%p2123_p7), %v2549_v36 }
  0x82   : > { %2292 = vmatpush3.bf16.msra.mxu1 (!%p2123_p7), %v2548_v35  ;;  %2324 = vmatpush3.bf16.msra.mxu0 (!%p2123_p7), %v2549_v36 }
  0x83   : > { %2293 = vmatprep.subr.bf16.mxu1 (!%p2123_p7), %v2550_v37  ;;  %2325 = vmatprep.subr.bf16.mxu0 (!%p2123_p7), %v2551_v38 }
  0x84   : > { %2278 = vmatmul.mubr.bf16.gmra.mrb[4].mxu0 %v2544_v47  ;;  %2286 = vmatmul.mubr.bf16.gmra.mrb[4].mxu1 %v2545_v48  ;;  %v2557_v47 = vld [vmem:[%s2907_s21 + $0x28] sm:$0xff] (!%p2123_p7)  }
  0x85   : > { %2337 = vmatprep.mubr.bf16.mxu0 (!%p2123_p7), %v915_v46 }
  0x86   : > { %2294 = vmatpush3.bf16.msra.mxu1 (!%p2123_p7), %v2550_v37  ;;  %2326 = vmatpush3.bf16.msra.mxu0 (!%p2123_p7), %v2551_v38 }
  0x87   : > { %2295 = vmatprep.subr.bf16.mxu1 (!%p2123_p7), %v2552_v39  ;;  %2327 = vmatprep.subr.bf16.mxu0 (!%p2123_p7), %v2553_v40 }
  0x8a   : > { %2296 = vmatpush3.bf16.msra.mxu1 (!%p2123_p7), %v2552_v39  ;;  %2328 = vmatpush3.bf16.msra.mxu0 (!%p2123_p7), %v2553_v40 }
  0x8b   : > { %2297 = vmatprep.subr.bf16.mxu1 (!%p2123_p7), %v2554_v41  ;;  %2329 = vmatprep.subr.bf16.mxu0 (!%p2123_p7), %v2555_v42 }
  0x8e   : > { %2298 = vmatpush3.bf16.msra.mxu1 (!%p2123_p7), %v2554_v41  ;;  %2330 = vmatpush3.bf16.msra.mxu0 (!%p2123_p7), %v2555_v42 }
  0x8f   : > { %2299 = vmatprep.subr.bf16.mxu1 (!%p2123_p7), %v2556_v43  ;;  %2331 = vmatprep.subr.bf16.mxu0 (!%p2123_p7), %v2557_v47 }
  0x92   : > { %2300 = vmatpush3.bf16.msra.mxu1 (!%p2123_p7), %v2556_v43  ;;  %2332 = vmatpush3.bf16.msra.mxu0 (!%p2123_p7), %v2557_v47 }
 0x14f   : > { %v2275_v53 = vpop.f32.mrb[0].mxu0  ;;  %v2283_v54 = vpop.f32.mrb[0].mxu1 }
 0x150   : > { %v877_v57 = vadd.f32 %v2275_v53, %v688_v49  ;;  %v885_v58 = vadd.f32 %v2283_v54, %v696_v50  ;;  %v812_v59 = vpop.f32.mrb[1].mxu0  ;;  %v844_v60 = vpop.f32.mrb[1].mxu1  ;;  %v2558_v49 = vld [vmem:[%s2912_s16 + $0x30] sm:$0xff] (!%p2123_p7)  }
 0x151   : > { %v875_v63 = vadd.f32 %v812_v59, %v686_v51  ;;  %v883_v0 = vadd.f32 %v844_v60, %v694_v52  ;;  %v2276_v1 = vpop.f32.mrb[2].mxu0  ;;  %v2284_v2 = vpop.f32.mrb[2].mxu1  ;;  %v2559_v50 = vld [vmem:[%s2907_s21 + $0x30] sm:$0xff] (!%p2123_p7)   ;;  %2301 = vmatprep.subr.bf16.mxu1 (!%p2123_p7), %v2558_v49  ;;  %v2560_v51 = vld [vmem:[%s2912_s16 + $0x38] sm:$0xff] (!%p2123_p7)   ;;  %v916_v59 = vld [vmem:[%s3005_s24 + $0x8] sm:$0xff] (!%p2123_p7) }
 0x152   : > { %893 = vst [vmem:[#allocation2 + $0x10] sm:$0xff] %v877_v57  ;;  %901 = vst [vmem:[#allocation2 + $0x50] sm:$0xff] %v885_v58  ;;  %v878_v3 = vadd.f32 %v2276_v1, %v689_v55  ;;  %v886_v4 = vadd.f32 %v2284_v2, %v697_v56  ;;  %v815_v5 = vpop.f32.mrb[3].mxu0  ;;  %v847_v6 = vpop.f32.mrb[3].mxu1  ;;  %2333 = vmatprep.subr.bf16.mxu0 (!%p2123_p7), %v2559_v50  ;;  %v2561_v52 = vld [vmem:[%s2907_s21 + $0x38] sm:$0xff] (!%p2123_p7)   ;;  %2302 = vmatpush3.bf16.msra.mxu1 (!%p2123_p7), %v2558_v49  ;;  %v917_v60 = vld [vmem:[%s3005_s24 + $0x10] sm:$0xff] (!%p2123_p7) }
 0x153   : > { %891 = vst [vmem:[#allocation2] sm:$0xff] %v875_v63  ;;  %899 = vst [vmem:[#allocation2 + $0x40] sm:$0xff] %v883_v0  ;;  %v876_v7 = vadd.f32 %v815_v5, %v687_v61  ;;  %v884_v8 = vadd.f32 %v847_v6, %v695_v62  ;;  %2334 = vmatpush3.bf16.msra.mxu0 (!%p2123_p7), %v2559_v50  ;;  %2303 = vmatprep.subr.bf16.mxu1 (!%p2123_p7), %v2560_v51 }
 0x154   : > { %894 = vst [vmem:[#allocation2 + $0x18] sm:$0xff] %v878_v3  ;;  %902 = vst [vmem:[#allocation2 + $0x58] sm:$0xff] %v886_v4  ;;  %2335 = vmatprep.subr.bf16.mxu0 (!%p2123_p7), %v2561_v52  ;;  %v918_v3 = vld [vmem:[%s3005_s24 + $0x18] sm:$0xff] (!%p2123_p7)  ;;  %v919_v4 = vld [vmem:[%s3005_s24 + $0x20] sm:$0xff] (!%p2123_p7) }
 0x155   : > { %892 = vst [vmem:[#allocation2 + $0x8] sm:$0xff] %v876_v7  ;;  %900 = vst [vmem:[#allocation2 + $0x48] sm:$0xff] %v884_v8 }
 0x156   : > { %2304 = vmatpush3.bf16.msra.mxu1 (!%p2123_p7), %v2560_v51 }
 0x157   : > { %v2279_v13 = vpop.f32.mrb[4].mxu0  ;;  %v2287_v14 = vpop.f32.mrb[4].mxu1  ;;  %910 = sbr.rel (%p2123_p7) target bundleno = 1566 (0x61e), region = 109  ;;  %2336 = vmatpush3.bf16.msra.mxu0 (!%p2123_p7), %v2561_v52 }
 0x158   : > { %v881_v17 = vadd.f32 %v2279_v13, %v692_v9  ;;  %v889_v18 = vadd.f32 %v2287_v14, %v700_v10  ;;  %v828_v19 = vpop.f32.mrb[5].mxu0  ;;  %v860_v20 = vpop.f32.mrb[5].mxu1 }
 0x159   : > { %v879_v23 = vadd.f32 %v828_v19, %v690_v11  ;;  %v887_v24 = vadd.f32 %v860_v20, %v698_v12  ;;  %v2280_v25 = vpop.f32.mrb[6].mxu0  ;;  %v2288_v26 = vpop.f32.mrb[6].mxu1  ;;  %v941_v53 = vld [vmem:[#allocation2 + $0x10] sm:$0xff] (!%p2123_p7)  ;;  %v920_v11 = vld [vmem:[%s3005_s24 + $0x28] sm:$0xff] (!%p2123_p7)  ;;  %v3025_v20 = vld [vmem:[%s497_s27] ss:$0 sm:$0xff] (!%p2123_p7)  ;;  %s2143_s27 = smin.u32 (!%p2123_p7), %s2728_s13, %s1413_s19 }
 0x15a   : > { %897 = vst [vmem:[#allocation2 + $0x30] sm:$0xff] %v881_v17  ;;  %905 = vst [vmem:[#allocation2 + $0x70] sm:$0xff] %v889_v18  ;;  %v882_v27 = vadd.f32 %v2280_v25, %v693_v15  ;;  %v890_v28 = vadd.f32 %v2288_v26, %v701_v16  ;;  %v831_v29 = vpop.f32.mrb[7].mxu0  ;;  %v863_v30 = vpop.f32.mrb[7].mxu1  ;;  %v939_v44 = vld [vmem:[#allocation2] sm:$0xff] (!%p2123_p7)  ;;  %2338 = vmatmul.mubr.bf16.vlgmr.msra.gmra.mrb[0].mxu0 (!%p2123_p7), %v916_v59  ;;  %v949_v5 = vld [vmem:[#allocation2 + $0x50] sm:$0xff] (!%p2123_p7) }
 0x15b   : > { %895 = vst [vmem:[#allocation2 + $0x20] sm:$0xff] %v879_v23  ;;  %903 = vst [vmem:[#allocation2 + $0x60] sm:$0xff] %v887_v24  ;;  %v880_v31 = vadd.f32 %v831_v29, %v691_v21  ;;  %v888_v32 = vadd.f32 %v863_v30, %v699_v22  ;;  %v942_v54 = vld [vmem:[#allocation2 + $0x18] sm:$0xff] (!%p2123_p7)  ;;  %2341 = vmatprep.mubr.bf16.mxu0 (!%p2123_p7), %v917_v60  ;;  %v947_v63 = vld [vmem:[#allocation2 + $0x40] sm:$0xff] (!%p2123_p7)  ;;  %s1415_s26 = sand.u32 (!%p2123_p7), 1, %s2143_s27  }
 0x15c   : > { %898 = vst [vmem:[#allocation2 + $0x38] sm:$0xff] %v882_v27  ;;  %906 = vst [vmem:[#allocation2 + $0x78] sm:$0xff] %v890_v28  ;;  %v940_v45 = vld [vmem:[#allocation2 + $0x8] sm:$0xff] (!%p2123_p7)  ;;  %v956_v57 = vpack.c.bf16 (!%p2123_p7), %v942_v54, %v941_v53  ;;  %v950_v6 = vld [vmem:[#allocation2 + $0x58] sm:$0xff] (!%p2123_p7)  ;;  %s1416_s28 = ssub.s32 (!%p2123_p7), 0, %s1415_s26 }
 0x15d   : > { %896 = vst [vmem:[#allocation2 + $0x28] sm:$0xff] %v880_v31  ;;  %904 = vst [vmem:[#allocation2 + $0x68] sm:$0xff] %v888_v32  ;;  %v955_v48 = vpack.c.bf16 (!%p2123_p7), %v940_v45, %v939_v44  ;;  %v948_v0 = vld [vmem:[#allocation2 + $0x48] sm:$0xff] (!%p2123_p7)  ;;  %v960_v9 = vpack.c.bf16 (!%p2123_p7), %v950_v6, %v949_v5  ;;  %v921_v12 = vld [vmem:[%s3005_s24 + $0x30] sm:$0xff] (!%p2123_p7) }
 0x15e   : > { %v959_v2 = vpack.c.bf16 %v948_v0, %v947_v63  ;;  %v922_v16 = vld [vmem:[%s3005_s24 + $0x38] sm:$0xff]  ;;  %s3454_s28 = smov (!%p1412_p8, %s1416_s28), %s1415_s26  ;;  %s2168_s1 = sshll.u32 (!%p2149_p10), %s2724_s12, 7 }
 0x15f   : > { %2305 = vmatprep.mubr.bf16.mxu1 %v955_v48  ;;  %p2145_p9 = scmp.lt.s32.totalorder %s3454_s28, 0  ;;  %s1422_s29 = sadd.s32 2, %s3454_s28 }
 0x160   : > { %2306 = vmatmul.mubr.bf16.vlgmr.msra.gmra.mrb[0].mxu1 %v956_v57  ;;  %s3332_s21 = scalar_lea.vmem (!%p2149_p10), %s3417_s9, %s2168_s1 }
 0x161   : > { %v945_v61 = vld [vmem:[#allocation2 + $0x30] sm:$0xff]  ;;  %s3456_s29 = smov (!%p2145_p9, %s1422_s29), %s3454_s28 }
 0x162   : > { %v943_v55 = vld [vmem:[#allocation2 + $0x20] sm:$0xff]  ;;  %2342 = vmatmul.mubr.bf16.gmra.mrb[4].mxu0 %v918_v3  ;;  %v953_v13 = vld [vmem:[#allocation2 + $0x70] sm:$0xff]  ;;  %s2146_s23 = sshll.u32 %s3456_s29, 1 }
 0x163   : > { %v946_v62 = vld [vmem:[#allocation2 + $0x38] sm:$0xff]  ;;  %2345 = vmatprep.mubr.bf16.mxu0 %v919_v4  ;;  %v951_v7 = vld [vmem:[#allocation2 + $0x60] sm:$0xff]  ;;  %s3111_s30 = sadd.s32 %s2724_s12, %s2146_s23 }
 0x164   : > { %v944_v56 = vld [vmem:[#allocation2 + $0x28] sm:$0xff]  ;;  %v958_v1 = vpack.c.bf16 %v946_v62, %v945_v61  ;;  %v954_v14 = vld [vmem:[#allocation2 + $0x78] sm:$0xff]  ;;  %s2176_s18 = sshll.u32 %s3111_s30, 6 }
 0x165   : > { %v957_v58 = vpack.c.bf16 %v944_v56, %v943_v55  ;;  %v952_v8 = vld [vmem:[#allocation2 + $0x68] sm:$0xff]  ;;  %v962_v15 = vpack.c.bf16 %v954_v14, %v953_v13  ;;  %s3123_s22 = scalar_lea.vmem [#allocation3], %s2176_s18 }
 0x166   : > { %v961_v10 = vpack.c.bf16 %v952_v8, %v951_v7 }
 0x167   : > { %2309 = vmatprep.mubr.bf16.mxu1 %v957_v58 }
 0x168   : > { %2310 = vmatmul.mubr.bf16.gmra.mrb[4].mxu1 %v958_v1 }
 0x169   : > { %2313 = vmatprep.mubr.bf16.mxu1 %v959_v2 }
 0x16a   : > { %2346 = vmatmul.mubr.bf16.gmra.mrb[8].mxu0 %v920_v11 }
 0x16b   : > { %2349 = vmatprep.mubr.bf16.mxu0 %v921_v12 }
 0x170   : > { %2314 = vmatmul.mubr.bf16.gmra.mrb[8].mxu1 %v960_v9 }
 0x171   : > { %2317 = vmatprep.mubr.bf16.mxu1 %v961_v10 }
 0x172   : > { %2350 = vmatmul.mubr.bf16.gmra.mrb[12].mxu0 %v922_v16 }
 0x178   : > { %2318 = vmatmul.mubr.bf16.gmra.mrb[12].mxu1 %v962_v15 }
 0x22d   : > { %v2339_v18 = vpop.f32.mrb[0].mxu0 }
 0x22e   : > { %v1206_v22 = vpop.f32.mrb[1].mxu0 }
 0x22f   : > { %v2340_v25 = vpop.f32.mrb[2].mxu0 }
 0x230   : > { %v1209_v28 = vpop.f32.mrb[3].mxu0 }
 0x233   : > { %v2307_v17 = vpop.f32.mrb[0].mxu1 }
 0x234   : > { %v1061_v19 = vpop.f32.mrb[1].mxu1  ;;  %v1215_v21 = vadd.f32 %v2339_v18, %v2307_v17 }
 0x235   : > { %v2308_v23 = vpop.f32.mrb[2].mxu1  ;;  %v1207_v24 = vadd.f32 %v1206_v22, %v1061_v19  ;;  %v2343_v37 = vpop.f32.mrb[4].mxu0 }
 0x236   : > { %v1064_v26 = vpop.f32.mrb[3].mxu1  ;;  %v1218_v27 = vadd.f32 %v2340_v25, %v2308_v23  ;;  %v3028_v29 = vadd.f32 %v3025_v20, %v1215_v21  ;;  %v1222_v40 = vpop.f32.mrb[5].mxu0 }
 0x237   : > { %v1210_v30 = vadd.f32 %v1209_v28, %v1064_v26  ;;  %v3031_v31 = vadd.f32 %v3025_v20, %v1207_v24  ;;  %v2344_v44 = vpop.f32.mrb[6].mxu0 }
 0x238   : > { %v3034_v32 = vadd.f32 %v3025_v20, %v1218_v27  ;;  %v1294_v33 = vmul.f32 %v3028_v29, %v3028_v29  ;;  %v1225_v49 = vpop.f32.mrb[7].mxu0 }
 0x239   : > { %v3039_v34 = vadd.f32 %v3025_v20, %v1210_v30  ;;  %v1292_v35 = vmul.f32 %v3031_v31, %v3031_v31 }
 0x23a   : > { %1312 = vadd.xlane.f32.xlu1 %v1294_v33  ;;  %v1295_v42 = vmul.f32 %v3034_v32, %v3034_v32 }
 0x23b   : > { %v2311_v36 = vpop.f32.mrb[4].mxu1  ;;  %1308 = vadd.xlane.f32.xlu0 %v1292_v35  ;;  %v1293_v46 = vmul.f32 %v3039_v34, %v3039_v34 }
 0x23c   : > { %v1077_v38 = vpop.f32.mrb[5].mxu1  ;;  %v1231_v39 = vadd.f32 %v2343_v37, %v2311_v36 }
 0x23d   : > { %v2312_v41 = vpop.f32.mrb[6].mxu1  ;;  %v1223_v43 = vadd.f32 %v1222_v40, %v1077_v38  ;;  %v2347_v57 = vpop.f32.mrb[8].mxu0 }
 0x23e   : > { %v1080_v45 = vpop.f32.mrb[7].mxu1  ;;  %v3048_v47 = vadd.f32 %v3025_v20, %v1231_v39  ;;  %v1234_v48 = vadd.f32 %v2344_v44, %v2312_v41  ;;  %1314 = vadd.xlane.f32.xlu1 %v1295_v42  ;;  %v1238_v60 = vpop.f32.mrb[9].mxu0 }
 0x23f   : > { %v1226_v50 = vadd.f32 %v1225_v49, %v1080_v45  ;;  %1310 = vadd.xlane.f32.xlu0 %v1293_v46  ;;  %v3056_v53 = vadd.f32 %v3025_v20, %v1223_v43  ;;  %v2348_v63 = vpop.f32.mrb[10].mxu0 }
 0x240   : > { %v3051_v51 = vadd.f32 %v3025_v20, %v1234_v48  ;;  %v1298_v52 = vmul.f32 %v3048_v47, %v3048_v47  ;;  %v1241_v4 = vpop.f32.mrb[11].mxu0 }
 0x241   : > { %v3059_v54 = vadd.f32 %v3025_v20, %v1226_v50  ;;  %v1296_v1 = vmul.f32 %v3056_v53, %v3056_v53 }
 0x242   : > { %v1299_v56 = vmul.f32 %v3051_v51, %v3051_v51 }
 0x243   : > { %v2315_v55 = vpop.f32.mrb[8].mxu1  ;;  %1320 = vadd.xlane.f32.xlu0 %v1298_v52  ;;  %v1297_v5 = vmul.f32 %v3059_v54, %v3059_v54 }
 0x244   : > { %v1093_v58 = vpop.f32.mrb[9].mxu1  ;;  %v1247_v59 = vadd.f32 %v2347_v57, %v2315_v55  ;;  %1322 = vadd.xlane.f32.xlu1 %v1299_v56 }
 0x245   : > { %v2316_v61 = vpop.f32.mrb[10].mxu1  ;;  %v1239_v62 = vadd.f32 %v1238_v60, %v1093_v58  ;;  %v2351_v13 = vpop.f32.mrb[12].mxu0 }
 0x246   : > { %v1096_v0 = vpop.f32.mrb[11].mxu1  ;;  %v3066_v2 = vadd.f32 %v3025_v20, %v1247_v59  ;;  %v1250_v3 = vadd.f32 %v2348_v63, %v2316_v61  ;;  %v1254_v16 = vpop.f32.mrb[13].mxu0 }
 0x247   : > { %v1242_v6 = vadd.f32 %v1241_v4, %v1096_v0  ;;  %1316 = vadd.xlane.f32.xlu0 %v1296_v1  ;;  %v3076_v9 = vadd.f32 %v3025_v20, %v1239_v62  ;;  %v2352_v19 = vpop.f32.mrb[14].mxu0 }
 0x248   : > { %v3071_v7 = vadd.f32 %v3025_v20, %v1250_v3  ;;  %1318 = vadd.xlane.f32.xlu1 %v1297_v5  ;;  %v1302_v8 = vmul.f32 %v3066_v2, %v3066_v2  ;;  %v1257_v24 = vpop.f32.mrb[15].mxu0 }
 0x249   : > { %v3079_v10 = vadd.f32 %v3025_v20, %v1242_v6  ;;  %v1300_v22 = vmul.f32 %v3076_v9, %v3076_v9 }
 0x24a   : > { %v1303_v12 = vmul.f32 %v3071_v7, %v3071_v7 }
 0x24b   : > { %v2319_v11 = vpop.f32.mrb[12].mxu1  ;;  %1328 = vadd.xlane.f32.xlu0 %v1302_v8  ;;  %v1301_v25 = vmul.f32 %v3079_v10, %v3079_v10 }
 0x24c   : > { %v1109_v14 = vpop.f32.mrb[13].mxu1  ;;  %v1263_v15 = vadd.f32 %v2351_v13, %v2319_v11  ;;  %1330 = vadd.xlane.f32.xlu1 %v1303_v12 }
 0x24d   : > { %v2320_v17 = vpop.f32.mrb[14].mxu1  ;;  %v1255_v18 = vadd.f32 %v1254_v16, %v1109_v14 }
 0x24e   : > { %v1112_v21 = vpop.f32.mrb[15].mxu1  ;;  %v1266_v23 = vadd.f32 %v2352_v19, %v2320_v17  ;;  %v3091_v28 = vadd.f32 %v3025_v20, %v1263_v15 }
 0x24f   : > { %v3088_v26 = vadd.f32 %v3025_v20, %v1255_v18  ;;  %v1258_v27 = vadd.f32 %v1257_v24, %v1112_v21  ;;  %1324 = vadd.xlane.f32.xlu0 %v1300_v22 }
 0x250   : > { %1326 = vadd.xlane.f32.xlu1 %v1301_v25  ;;  %v3099_v35 = vadd.f32 %v3025_v20, %v1266_v23  ;;  %v1306_v37 = vmul.f32 %v3091_v28, %v3091_v28 }
 0x251   : > { %v3094_v30 = vadd.f32 %v3025_v20, %v1258_v27  ;;  %v1304_v33 = vmul.f32 %v3088_v26, %v3088_v26 }
 0x252   : > { %v1307_v38 = vmul.f32 %v3099_v35, %v3099_v35 }
 0x253   : > { %1332 = vadd.xlane.f32.xlu0 %v1304_v33  ;;  %v1305_v36 = vmul.f32 %v3094_v30, %v3094_v30 }
 0x255   : > { %1334 = vadd.xlane.f32.xlu1 %v1305_v36 }
 0x257   : > { %1336 = vadd.xlane.f32.xlu0 %v1306_v37 }
 0x259   : > { %1338 = vadd.xlane.f32.xlu1 %v1307_v38 }
 0x2c7   : > { %v1313_v20 = vpop.xlane.xlu1 %1312 }
 0x2c8   : > { %v1342_v39 = vmax.f32 %v1313_v20, 1e-24  ;;  %v1309_v40 = vpop.xlane.xlu0 %1308 }
 0x2c9   : > { %v1340_v41 = vmax.f32 %v1309_v40, 1e-24 }
 0x2ca   : > { %2562 = vrsqrt.f32 %v1342_v39 }
 0x2cb   : > { %2564 = vrsqrt.f32 %v1340_v41  ;;  %v1315_v42 = vpop.xlane.xlu1 %1314 }
 0x2cc   : > { %v1343_v43 = vmax.f32 %v1315_v42, 1e-24  ;;  %v1311_v44 = vpop.xlane.xlu0 %1310 }
 0x2cd   : > { %v1341_v45 = vmax.f32 %v1311_v44, 1e-24 }
 0x2ce   : > { %2566 = vrsqrt.f32 %v1343_v43 }
 0x2cf   : > { %2568 = vrsqrt.f32 %v1341_v45 }
 0x2d0   : > { %v1321_v46 = vpop.xlane.xlu0 %1320 }
 0x2d1   : > { %v1346_v48 = vmax.f32 %v1321_v46, 1e-24  ;;  %v1323_v49 = vpop.xlane.xlu1 %1322 }
 0x2d2   : > { %v1347_v50 = vmax.f32 %v1323_v49, 1e-24 }
 0x2d3   : > { %2570 = vrsqrt.f32 %v1346_v48 }
 0x2d4   : > { %v2563_v52 = vpop.eup %2562  ;;  %2572 = vrsqrt.f32 %v1347_v50  ;;  %v1317_v55 = vpop.xlane.xlu0 %1316 }
 0x2d5   : > { %v2565_v56 = vpop.eup %2564  ;;  %v1344_v57 = vmax.f32 %v1317_v55, 1e-24  ;;  %v1319_v58 = vpop.xlane.xlu1 %1318  ;;  %v1374_v60 = vmul.f32 %v2563_v52, %v3028_v29 }
 0x2d6   : > { %v1345_v59 = vmax.f32 %v1319_v58, 1e-24  ;;  %v1372_v62 = vmul.f32 %v2565_v56, %v3031_v31 }
 0x2d7   : > { %2574 = vrsqrt.f32 %v1344_v57  ;;  %v1390_v8 = vmax.f32 %v1374_v60, 0.0 }
 0x2d8   : > { %v2567_v61 = vpop.eup %2566  ;;  %2576 = vrsqrt.f32 %v1345_v59  ;;  %v1329_v63 = vpop.xlane.xlu0 %1328  ;;  %v1388_v12 = vmax.f32 %v1372_v62, 0.0 }
 0x2d9   : > { %v2569_v0 = vpop.eup %2568  ;;  %v1375_v1 = vmul.f32 %v2567_v61, %v3034_v32  ;;  %v1350_v3 = vmax.f32 %v1329_v63, 1e-24  ;;  %v1331_v4 = vpop.xlane.xlu1 %1330 }
 0x2da   : > { %v1373_v5 = vmul.f32 %v2569_v0, %v3039_v34  ;;  %v1351_v6 = vmax.f32 %v1331_v4, 1e-24 }
 0x2db   : > { %v1391_v11 = vmax.f32 %v1375_v1, 0.0  ;;  %2578 = vrsqrt.f32 %v1350_v3 }
 0x2dc   : > { %v1389_v29 = vmax.f32 %v1373_v5, 0.0  ;;  %2580 = vrsqrt.f32 %v1351_v6  ;;  %v1325_v13 = vpop.xlane.xlu0 %1324 }
 0x2dd   : > { %v2571_v14 = vpop.eup %2570  ;;  %v3118_v31 = vpack.c.bf16 %v1391_v11, %v1390_v8  ;;  %v1348_v15 = vmax.f32 %v1325_v13, 1e-24  ;;  %v1327_v16 = vpop.xlane.xlu1 %1326  ;;  %v2602_v8 = vld [vmem:[%s3415_s7] sm:$0xff] (!%p2149_p10)   ;;  %v2603_v11 = vld [vmem:[%s3415_s7 + $0x8] sm:$0xff] (!%p2149_p10)  }
 0x2de   : > { %v2573_v17 = vpop.eup %2572  ;;  %v3120_v18 = vpack.c.bf16 %v1389_v29, %v1388_v12  ;;  %v1378_v32 = vmul.f32 %v2571_v14, %v3048_v47  ;;  %v1349_v19 = vmax.f32 %v1327_v16, 1e-24  ;;  %2385 = vmatprep.subr.bf16.mxu1 (!%p2149_p10), %v2602_v8  ;;  %v2598_v12 = vld [vmem:[%s3413_s5 + $0x20] sm:$0xff] (!%p2149_p10)   ;;  %v2604_v29 = vld [vmem:[%s3415_s7 + $0x10] sm:$0xff] (!%p2149_p10)   ;;  %v2599_v13 = vld [vmem:[%s3413_s5 + $0x28] sm:$0xff] (!%p2149_p10)  }
 0x2df   : > { %1430 = vst [vmem:[%s3123_s22 + $0x8] sm:$0xff] %v3118_v31  ;;  %v1379_v34 = vmul.f32 %v2573_v17, %v3051_v51  ;;  %2582 = vrsqrt.f32 %v1348_v15  ;;  %2386 = vmatpush3.bf16.msra.mxu1 (!%p2149_p10), %v2602_v8  ;;  %v2605_v14 = vld [vmem:[%s3415_s7 + $0x18] sm:$0xff] (!%p2149_p10)   ;;  %v2600_v15 = vld [vmem:[%s3413_s5 + $0x30] sm:$0xff] (!%p2149_p10)   ;;  %v2606_v16 = vld [vmem:[%s3415_s7 + $0x20] sm:$0xff] (!%p2149_p10)  }
 0x2e0   : > { %1429 = vst [vmem:[%s3123_s22] sm:$0xff] %v3120_v18  ;;  %v1394_v21 = vmax.f32 %v1378_v32, 0.0  ;;  %2584 = vrsqrt.f32 %v1349_v19  ;;  %v1333_v22 = vpop.xlane.xlu0 %1332  ;;  %2369 = vmatprep.mubr.bf16.mxu0 (!%p2149_p10), %v3120_v18  ;;  %2387 = vmatprep.subr.bf16.mxu1 (!%p2149_p10), %v2603_v11  ;;  %v2601_v17 = vld [vmem:[%s3413_s5 + $0x38] sm:$0xff] (!%p2149_p10)   ;;  %v2607_v18 = vld [vmem:[%s3415_s7 + $0x28] sm:$0xff] (!%p2149_p10)   ;;  %v2608_v32 = vld [vmem:[%s3415_s7 + $0x30] sm:$0xff] (!%p2149_p10)  }
 0x2e1   : > { %v2575_v23 = vpop.eup %2574  ;;  %v1395_v24 = vmax.f32 %v1379_v34, 0.0  ;;  %v1352_v25 = vmax.f32 %v1333_v22, 1e-24  ;;  %v2609_v19 = vld [vmem:[%s3415_s7 + $0x38] sm:$0xff] (!%p2149_p10)   ;;  %v2150_v34 = vld [vmem:[%s3414_s6] ss:$0 sm:$0xff] (!%p2149_p10) }
 0x2e2   : > { %v2577_v47 = vpop.eup %2576  ;;  %v1376_v27 = vmul.f32 %v2575_v23, %v3056_v53  ;;  %v1335_v33 = vpop.xlane.xlu1 %1334 }
 0x2e3   : > { %v3131_v36 = vpack.c.bf16 %v1395_v24, %v1394_v21  ;;  %v1377_v37 = vmul.f32 %v2577_v47, %v3059_v54  ;;  %2586 = vrsqrt.f32 %v1352_v25  ;;  %v1353_v51 = vmax.f32 %v1335_v33, 1e-24  ;;  %2388 = vmatpush3.bf16.msra.mxu1 (!%p2149_p10), %v2603_v11 }
 0x2e4   : > { %v1392_v38 = vmax.f32 %v1376_v27, 0.0  ;;  %v1337_v20 = vpop.xlane.xlu0 %1336  ;;  %2389 = vmatprep.subr.bf16.mxu1 (!%p2149_p10), %v2604_v29 }
 0x2e5   : > { %v2579_v39 = vpop.eup %2578  ;;  %1432 = vst [vmem:[%s3123_s22 + $0x18] sm:$0xff] %v3131_v36  ;;  %v1393_v40 = vmax.f32 %v1377_v37, 0.0  ;;  %2588 = vrsqrt.f32 %v1353_v51  ;;  %v1354_v41 = vmax.f32 %v1337_v20, 1e-24 }
 0x2e6   : > { %v2581_v42 = vpop.eup %2580  ;;  %v1382_v43 = vmul.f32 %v2579_v39, %v3066_v2  ;;  %v1339_v53 = vpop.xlane.xlu1 %1338 }
 0x2e7   : > { %v3137_v44 = vpack.c.bf16 %v1393_v40, %v1392_v38  ;;  %v1383_v54 = vmul.f32 %v2581_v42, %v3071_v7  ;;  %2590 = vrsqrt.f32 %v1354_v41  ;;  %v1355_v45 = vmax.f32 %v1339_v53, 1e-24  ;;  %2390 = vmatpush3.bf16.msra.mxu1 (!%p2149_p10), %v2604_v29 }
 0x2e8   : > { %v1398_v46 = vmax.f32 %v1382_v43, 0.0  ;;  %2391 = vmatprep.subr.bf16.mxu1 (!%p2149_p10), %v2605_v14 }
 0x2e9   : > { %v2583_v48 = vpop.eup %2582  ;;  %1431 = vst [vmem:[%s3123_s22 + $0x10] sm:$0xff] %v3137_v44  ;;  %v1399_v49 = vmax.f32 %v1383_v54, 0.0  ;;  %2592 = vrsqrt.f32 %v1355_v45 }
 0x2ea   : > { %v2585_v50 = vpop.eup %2584  ;;  %v1380_v52 = vmul.f32 %v2583_v48, %v3076_v9 }
 0x2eb   : > { %v3143_v55 = vpack.c.bf16 %v1399_v49, %v1398_v46  ;;  %v1381_v2 = vmul.f32 %v2585_v50, %v3079_v10  ;;  %2392 = vmatpush3.bf16.msra.mxu1 (!%p2149_p10), %v2605_v14 }
 0x2ec   : > { %v1396_v56 = vmax.f32 %v1380_v52, 0.0  ;;  %2393 = vmatprep.subr.bf16.mxu1 (!%p2149_p10), %v2606_v16 }
 0x2ed   : > { %v2587_v57 = vpop.eup %2586  ;;  %1434 = vst [vmem:[%s3123_s22 + $0x28] sm:$0xff] %v3143_v55  ;;  %v1397_v7 = vmax.f32 %v1381_v2, 0.0 }
 0x2ee   : > { %v1384_v58 = vmul.f32 %v2587_v57, %v3088_v26  ;;  %v2594_v26 = vld [vmem:[%s3413_s5] sm:$0xff] (!%p2149_p10)  }
 0x2ef   : > { %v2589_v59 = vpop.eup %2588  ;;  %v1408_v60 = vpack.c.bf16 %v1397_v7, %v1396_v56  ;;  %2353 = vmatprep.subr.bf16.mxu0 (!%p2149_p10), %v2594_v26  ;;  %2394 = vmatpush3.bf16.msra.mxu1 (!%p2149_p10), %v2606_v16 }
 0x2f0   : > { %v1385_v61 = vmul.f32 %v2589_v59, %v3094_v30  ;;  %v1400_v9 = vmax.f32 %v1384_v58, 0.0  ;;  %2354 = vmatpush3.bf16.msra.mxu0 (!%p2149_p10), %v2594_v26  ;;  %v2596_v30 = vld [vmem:[%s3413_s5 + $0x10] sm:$0xff] (!%p2149_p10)   ;;  %2395 = vmatprep.subr.bf16.mxu1 (!%p2149_p10), %v2607_v18 }
 0x2f1   : > { %v2591_v62 = vpop.eup %2590  ;;  %1433 = vst [vmem:[%s3123_s22 + $0x20] sm:$0xff] %v1408_v60 }
 0x2f2   : > { %v1401_v63 = vmax.f32 %v1385_v61, 0.0  ;;  %v1386_v0 = vmul.f32 %v2591_v62, %v3091_v28  ;;  %v2595_v28 = vld [vmem:[%s3413_s5 + $0x8] sm:$0xff] (!%p2149_p10)  }
 0x2f3   : > { %v2593_v10 = vpop.eup %2592  ;;  %2355 = vmatprep.subr.bf16.mxu0 (!%p2149_p10), %v2595_v28  ;;  %2396 = vmatpush3.bf16.msra.mxu1 (!%p2149_p10), %v2607_v18 }
 0x2f4   : > { %v1410_v1 = vpack.c.bf16 %v1401_v63, %v1400_v9  ;;  %v1387_v3 = vmul.f32 %v2593_v10, %v3099_v35  ;;  %v1402_v4 = vmax.f32 %v1386_v0, 0.0  ;;  %1440 = sbr.rel (%p2149_p10) target bundleno = 1566 (0x61e), region = 113  ;;  %2356 = vmatpush3.bf16.msra.mxu0 (!%p2149_p10), %v2595_v28  ;;  %v2597_v35 = vld [vmem:[%s3413_s5 + $0x18] sm:$0xff] (!%p2149_p10)   ;;  %2397 = vmatprep.subr.bf16.mxu1 (!%p2149_p10), %v2608_v32  ;;  %v2159_v0 = vld [vmem:[%s3416_s8] ss:$0 sm:$0xff] (!%p2149_p10) }
 0x2f5   : > { %2357 = vmatprep.subr.bf16.mxu0 (!%p2149_p10), %v2596_v30 }
 0x2f6   : > { %1435 = vst [vmem:[%s3123_s22 + $0x30] sm:$0xff] %v1410_v1  ;;  %v1403_v5 = vmax.f32 %v1387_v3, 0.0 }
 0x2f7   : > { %2398 = vmatpush3.bf16.msra.mxu1 (!%p2149_p10), %v2608_v32 }
 0x2f8   : > { %v1411_v6 = vpack.c.bf16 %v1403_v5, %v1402_v4  ;;  %2358 = vmatpush3.bf16.msra.mxu0 (!%p2149_p10), %v2596_v30  ;;  %2399 = vmatprep.subr.bf16.mxu1 (!%p2149_p10), %v2609_v19 }
 0x2f9   : > { %2359 = vmatprep.subr.bf16.mxu0 (!%p2149_p10), %v2597_v35 }
 0x2fa   : > { %1436 = vst [vmem:[%s3123_s22 + $0x38] sm:$0xff] %v1411_v6 }
 0x2fb   : > { %2400 = vmatpush3.bf16.msra.mxu1 %v2609_v19 }
 0x2fc   : > { %2360 = vmatpush3.bf16.msra.mxu0 %v2597_v35 }
 0x2fd   : > { %2361 = vmatprep.subr.bf16.mxu0 %v2598_v12 }
 0x300   : > { %2362 = vmatpush3.bf16.msra.mxu0 %v2598_v12 }
 0x301   : > { %2363 = vmatprep.subr.bf16.mxu0 %v2599_v13 }
 0x304   : > { %2364 = vmatpush3.bf16.msra.mxu0 %v2599_v13 }
 0x305   : > { %2365 = vmatprep.subr.bf16.mxu0 %v2600_v15 }
 0x308   : > { %2366 = vmatpush3.bf16.msra.mxu0 %v2600_v15 }
 0x309   : > { %2367 = vmatprep.subr.bf16.mxu0 %v2601_v17 }
 0x30c   : > { %2368 = vmatpush3.bf16.msra.mxu0 %v2601_v17 }
 0x30f   : > { %2370 = vmatmul.mubr.bf16.vlgmr.msra.gmra.mrb[0].mxu0 %v3118_v31 }
 0x310   : > { %2373 = vmatprep.mubr.bf16.mxu0 %v3137_v44 }
 0x317   : > { %2374 = vmatmul.mubr.bf16.gmra.mrb[4].mxu0 %v3131_v36 }
 0x318   : > { %2377 = vmatprep.mubr.bf16.mxu0 %v1408_v60 }
 0x31f   : > { %2378 = vmatmul.mubr.bf16.gmra.mrb[8].mxu0 %v3143_v55 }
 0x320   : > { %2381 = vmatprep.mubr.bf16.mxu0 %v1410_v1 }
 0x327   : > { %2382 = vmatmul.mubr.bf16.gmra.mrb[12].mxu0 %v1411_v6 }
 0x3e2   : > { %v2371_v31 = vpop.f32.mrb[0].mxu0 }
 0x3e3   : > { %v1546_v21 = vpop.f32.mrb[1].mxu0  ;;  %v1555_v23 = vadd.f32 %v2371_v31, %v2150_v34 }
 0x3e4   : > { %v2372_v22 = vpop.f32.mrb[2].mxu0  ;;  %v1547_v47 = vadd.f32 %v2150_v34, %v1546_v21 }
 0x3e5   : > { %v1558_v24 = vadd.f32 %v2372_v22, %v2150_v34  ;;  %v1549_v25 = vpop.f32.mrb[3].mxu0 }
 0x3e6   : > { %v1550_v27 = vadd.f32 %v2150_v34, %v1549_v25 }
 0x3e7   : > { %v1610_v33 = vpack.c.bf16 %v1558_v24, %v1555_v23 }
 0x3e8   : > { %v1609_v36 = vpack.c.bf16 %v1550_v27, %v1547_v47 }
 0x3ea   : > { %v2375_v37 = vpop.f32.mrb[4].mxu0  ;;  %2401 = vmatprep.mubr.bf16.mxu1 %v1609_v36 }
 0x3eb   : > { %v1571_v51 = vadd.f32 %v2375_v37, %v2150_v34  ;;  %v1562_v38 = vpop.f32.mrb[5].mxu0  ;;  %2402 = vmatmul.mubr.bf16.vlgmr.msra.gmra.mrb[0].mxu1 %v1610_v33 }
 0x3ec   : > { %v2376_v20 = vpop.f32.mrb[6].mxu0  ;;  %v1563_v41 = vadd.f32 %v2150_v34, %v1562_v38 }
 0x3ed   : > { %v1574_v39 = vadd.f32 %v2376_v20, %v2150_v34  ;;  %v1565_v40 = vpop.f32.mrb[7].mxu0 }
 0x3ee   : > { %v1566_v42 = vadd.f32 %v2150_v34, %v1565_v40 }
 0x3ef   : > { %v1612_v43 = vpack.c.bf16 %v1574_v39, %v1571_v51 }
 0x3f0   : > { %v1611_v53 = vpack.c.bf16 %v1566_v42, %v1563_v41 }
 0x3f2   : > { %v2379_v44 = vpop.f32.mrb[8].mxu0  ;;  %2405 = vmatprep.mubr.bf16.mxu1 %v1611_v53 }
 0x3f3   : > { %v1587_v54 = vadd.f32 %v2379_v44, %v2150_v34  ;;  %v1578_v45 = vpop.f32.mrb[9].mxu0  ;;  %2406 = vmatmul.mubr.bf16.gmra.mrb[4].mxu1 %v1612_v43 }
 0x3f4   : > { %v2380_v46 = vpop.f32.mrb[10].mxu0  ;;  %v1579_v50 = vadd.f32 %v2150_v34, %v1578_v45 }
 0x3f5   : > { %v1590_v48 = vadd.f32 %v2380_v46, %v2150_v34  ;;  %v1581_v49 = vpop.f32.mrb[11].mxu0 }
 0x3f6   : > { %v1582_v52 = vadd.f32 %v2150_v34, %v1581_v49 }
 0x3f7   : > { %v1614_v55 = vpack.c.bf16 %v1590_v48, %v1587_v54 }
 0x3f8   : > { %v1613_v2 = vpack.c.bf16 %v1582_v52, %v1579_v50 }
 0x3fa   : > { %v2383_v56 = vpop.f32.mrb[12].mxu0  ;;  %2409 = vmatprep.mubr.bf16.mxu1 %v1613_v2 }
 0x3fb   : > { %v1603_v57 = vadd.f32 %v2383_v56, %v2150_v34  ;;  %v1594_v7 = vpop.f32.mrb[13].mxu0  ;;  %2410 = vmatmul.mubr.bf16.gmra.mrb[8].mxu1 %v1614_v55 }
 0x3fc   : > { %v2384_v58 = vpop.f32.mrb[14].mxu0  ;;  %v1595_v61 = vadd.f32 %v2150_v34, %v1594_v7 }
 0x3fd   : > { %v1606_v59 = vadd.f32 %v2384_v58, %v2150_v34  ;;  %v1597_v60 = vpop.f32.mrb[15].mxu0 }
 0x3fe   : > { %v1598_v62 = vadd.f32 %v2150_v34, %v1597_v60 }
 0x3ff   : > { %v1616_v9 = vpack.c.bf16 %v1606_v59, %v1603_v57 }
 0x400   : > { %v1615_v63 = vpack.c.bf16 %v1598_v62, %v1595_v61 }
 0x402   : > { %2413 = vmatprep.mubr.bf16.mxu1 %v1615_v63 }
 0x403   : > { %2414 = vmatmul.mubr.bf16.gmra.mrb[12].mxu1 %v1616_v9 }
 0x4be   : > { %v2403_v10 = vpop.f32.mrb[0].mxu1 }
 0x4bf   : > { %v3215_v1 = vadd.f32 %v2403_v10, %v2159_v0  ;;  %v1722_v3 = vpop.f32.mrb[1].mxu1 }
 0x4c0   : > { %v3217_v4 = vadd.f32 %v2159_v0, %v1722_v3  ;;  %v2404_v5 = vpop.f32.mrb[2].mxu1 }
 0x4c1   : > { %1789 = vmax.xlane.f32.xlu1 %v3215_v1  ;;  %v1725_v6 = vpop.f32.mrb[3].mxu1  ;;  %v3221_v26 = vadd.f32 %v2404_v5, %v2159_v0 }
 0x4c2   : > { %1785 = vmax.xlane.f32.xlu0 %v3217_v4  ;;  %v3223_v28 = vadd.f32 %v2159_v0, %v1725_v6 }
 0x4c5   : > { %1791 = vmax.xlane.f32.xlu1 %v3221_v26 }
 0x4c6   : > { %v2407_v30 = vpop.f32.mrb[4].mxu1  ;;  %1787 = vmax.xlane.f32.xlu0 %v3223_v28 }
 0x4c7   : > { %v3227_v35 = vadd.f32 %v2407_v30, %v2159_v0  ;;  %v1738_v8 = vpop.f32.mrb[5].mxu1 }
 0x4c8   : > { %v2408_v11 = vpop.f32.mrb[6].mxu1  ;;  %v3233_v13 = vadd.f32 %v2159_v0, %v1738_v8 }
 0x4c9   : > { %v3229_v12 = vadd.f32 %v2408_v11, %v2159_v0  ;;  %v1741_v29 = vpop.f32.mrb[7].mxu1 }
 0x4ca   : > { %1797 = vmax.xlane.f32.xlu0 %v3227_v35  ;;  %v3235_v14 = vadd.f32 %v2159_v0, %v1741_v29 }
 0x4cb   : > { %1799 = vmax.xlane.f32.xlu1 %v3229_v12 }
 0x4ce   : > { %v2411_v15 = vpop.f32.mrb[8].mxu1  ;;  %1793 = vmax.xlane.f32.xlu0 %v3233_v13 }
 0x4cf   : > { %v3238_v16 = vadd.f32 %v2411_v15, %v2159_v0  ;;  %v1754_v17 = vpop.f32.mrb[9].mxu1  ;;  %1795 = vmax.xlane.f32.xlu1 %v3235_v14 }
 0x4d0   : > { %v2412_v18 = vpop.f32.mrb[10].mxu1  ;;  %v3245_v31 = vadd.f32 %v2159_v0, %v1754_v17 }
 0x4d1   : > { %v3241_v32 = vadd.f32 %v2412_v18, %v2159_v0  ;;  %v1757_v19 = vpop.f32.mrb[11].mxu1 }
 0x4d2   : > { %1805 = vmax.xlane.f32.xlu0 %v3238_v16  ;;  %v3247_v34 = vadd.f32 %v2159_v0, %v1757_v19 }
 0x4d3   : > { %1807 = vmax.xlane.f32.xlu1 %v3241_v32 }
 0x4d6   : > { %v2415_v21 = vpop.f32.mrb[12].mxu1  ;;  %1801 = vmax.xlane.f32.xlu0 %v3245_v31 }
 0x4d7   : > { %v1770_v22 = vpop.f32.mrb[13].mxu1  ;;  %1803 = vmax.xlane.f32.xlu1 %v3247_v34  ;;  %v3256_v27 = vadd.f32 %v2415_v21, %v2159_v0 }
 0x4d8   : > { %v3251_v23 = vadd.f32 %v2159_v0, %v1770_v22  ;;  %v2416_v24 = vpop.f32.mrb[14].mxu1 }
 0x4d9   : > { %v1773_v25 = vpop.f32.mrb[15].mxu1  ;;  %v3259_v33 = vadd.f32 %v2416_v24, %v2159_v0 }
 0x4da   : > { %v3253_v47 = vadd.f32 %v2159_v0, %v1773_v25  ;;  %1809 = vmax.xlane.f32.xlu0 %v3251_v23 }
 0x4dc   : > { %1811 = vmax.xlane.f32.xlu1 %v3253_v47 }
 0x4de   : > { %1813 = vmax.xlane.f32.xlu0 %v3256_v27 }
 0x4e0   : > { %1815 = vmax.xlane.f32.xlu1 %v3259_v33 }
 0x54e   : > { %v3263_v36 = vpop.xlane.xlu1 %1789 }
 0x54f   : > { %v1819_v37 = vsub.f32 %v3215_v1, %v3263_v36  ;;  %v3267_v51 = vpop.xlane.xlu0 %1785 }
 0x550   : > { %v1817_v38 = vsub.f32 %v3217_v4, %v3267_v51 }
 0x551   : > { %v1837_v20 = vmul.f32 1.442695, %v1819_v37 }
 0x552   : > { %v1833_v39 = vmul.f32 1.442695, %v1817_v38  ;;  %v3271_v40 = vpop.xlane.xlu1 %1791 }
 0x553   : > { %2610 = vpow2.f32 %v1837_v20  ;;  %v1820_v41 = vsub.f32 %v3221_v26, %v3271_v40  ;;  %v3275_v42 = vpop.xlane.xlu0 %1787 }
 0x554   : > { %v1818_v43 = vsub.f32 %v3223_v28, %v3275_v42  ;;  %2612 = vpow2.f32 %v1833_v39 }
 0x555   : > { %v1839_v53 = vmul.f32 1.442695, %v1820_v41 }
 0x556   : > { %v1835_v44 = vmul.f32 1.442695, %v1818_v43 }
 0x557   : > { %2614 = vpow2.f32 %v1839_v53  ;;  %v3279_v54 = vpop.xlane.xlu0 %1797 }
 0x558   : > { %v1823_v45 = vsub.f32 %v3227_v35, %v3279_v54  ;;  %v3283_v46 = vpop.xlane.xlu1 %1799  ;;  %2616 = vpow2.f32 %v1835_v44 }
 0x559   : > { %v1824_v48 = vsub.f32 %v3229_v12, %v3283_v46 }
 0x55a   : > { %v1845_v49 = vmul.f32 1.442695, %v1823_v45 }
 0x55b   : > { %v1847_v50 = vmul.f32 1.442695, %v1824_v48  ;;  %v3287_v52 = vpop.xlane.xlu0 %1793 }
 0x55c   : > { %2618 = vpow2.f32 %v1845_v49  ;;  %v1821_v55 = vsub.f32 %v3233_v13, %v3287_v52  ;;  %v3291_v2 = vpop.xlane.xlu1 %1795 }
 0x55d   : > { %v2611_v56 = vpop.eup %2610  ;;  %v1822_v57 = vsub.f32 %v3235_v14, %v3291_v2  ;;  %2620 = vpow2.f32 %v1847_v50 }
 0x55e   : > { %v1841_v7 = vmul.f32 1.442695, %v1821_v55  ;;  %1869 = vadd.xlane.f32.xlu0 %v2611_v56  ;;  %v2613_v60 = vpop.eup %2612 }
 0x55f   : > { %v1843_v58 = vmul.f32 1.442695, %v1822_v57  ;;  %v3295_v59 = vpop.xlane.xlu0 %1805 }
 0x560   : > { %2622 = vpow2.f32 %v1841_v7  ;;  %v1827_v61 = vsub.f32 %v3238_v16, %v3295_v59  ;;  %v3299_v62 = vpop.xlane.xlu1 %1807 }
 0x561   : > { %v2615_v9 = vpop.eup %2614  ;;  %v1828_v63 = vsub.f32 %v3241_v32, %v3299_v62  ;;  %2624 = vpow2.f32 %v1843_v58 }
 0x562   : > { %v1853_v0 = vmul.f32 1.442695, %v1827_v61  ;;  %1871 = vadd.xlane.f32.xlu1 %v2615_v9  ;;  %1865 = vadd.xlane.f32.xlu0 %v2613_v60  ;;  %v2617_v30 = vpop.eup %2616 }
 0x563   : > { %v1855_v10 = vmul.f32 1.442695, %v1828_v63  ;;  %v3303_v3 = vpop.xlane.xlu0 %1801 }
 0x564   : > { %2626 = vpow2.f32 %v1853_v0  ;;  %v1825_v5 = vsub.f32 %v3245_v31, %v3303_v3  ;;  %v3307_v6 = vpop.xlane.xlu1 %1803 }
 0x565   : > { %v1826_v8 = vsub.f32 %v3247_v34, %v3307_v6  ;;  %2628 = vpow2.f32 %v1855_v10 }
 0x566   : > { %v2619_v11 = vpop.eup %2618  ;;  %v1849_v29 = vmul.f32 1.442695, %v1825_v5  ;;  %1867 = vadd.xlane.f32.xlu1 %v2617_v30 }
 0x567   : > { %v1851_v15 = vmul.f32 1.442695, %v1826_v8  ;;  %1877 = vadd.xlane.f32.xlu0 %v2619_v11  ;;  %v3311_v17 = vpop.xlane.xlu0 %1809  ;;  %v2621_v19 = vpop.eup %2620 }
 0x568   : > { %2630 = vpow2.f32 %v1849_v29  ;;  %v1829_v18 = vsub.f32 %v3251_v23, %v3311_v17 }
 0x569   : > { %v3315_v21 = vpop.xlane.xlu1 %1811  ;;  %2632 = vpow2.f32 %v1851_v15 }
 0x56a   : > { %v2623_v22 = vpop.eup %2622  ;;  %v1857_v24 = vmul.f32 1.442695, %v1829_v18  ;;  %v1830_v25 = vsub.f32 %v3253_v47, %v3315_v21  ;;  %1879 = vadd.xlane.f32.xlu1 %v2621_v19 }
 0x56b   : > { %1873 = vadd.xlane.f32.xlu0 %v2623_v22  ;;  %v3319_v37 = vpop.xlane.xlu0 %1813  ;;  %v2625_v39 = vpop.eup %2624 }
 0x56c   : > { %2634 = vpow2.f32 %v1857_v24  ;;  %v1859_v38 = vmul.f32 1.442695, %v1830_v25  ;;  %v1831_v20 = vsub.f32 %v3256_v27, %v3319_v37 }
 0x56d   : > { %v3323_v41 = vpop.xlane.xlu1 %1815 }
 0x56e   : > { %v2627_v43 = vpop.eup %2626  ;;  %2636 = vpow2.f32 %v1859_v38  ;;  %v1861_v53 = vmul.f32 1.442695, %v1831_v20  ;;  %v1832_v44 = vsub.f32 %v3259_v33, %v3323_v41  ;;  %1875 = vadd.xlane.f32.xlu1 %v2625_v39 }
 0x56f   : > { %1885 = vadd.xlane.f32.xlu0 %v2627_v43  ;;  %v2629_v48 = vpop.eup %2628 }
 0x570   : > { %2638 = vpow2.f32 %v1861_v53  ;;  %v1863_v45 = vmul.f32 1.442695, %v1832_v44 }
 0x572   : > { %v2631_v49 = vpop.eup %2630  ;;  %2640 = vpow2.f32 %v1863_v45  ;;  %1887 = vadd.xlane.f32.xlu1 %v2629_v48 }
 0x573   : > { %1881 = vadd.xlane.f32.xlu0 %v2631_v49  ;;  %v2633_v50 = vpop.eup %2632 }
 0x576   : > { %v2635_v55 = vpop.eup %2634  ;;  %1883 = vadd.xlane.f32.xlu1 %v2633_v50 }
 0x577   : > { %1889 = vadd.xlane.f32.xlu0 %v2635_v55 }
 0x578   : > { %v2637_v56 = vpop.eup %2636 }
 0x57a   : > { %v2639_v57 = vpop.eup %2638  ;;  %1891 = vadd.xlane.f32.xlu1 %v2637_v56 }
 0x57b   : > { %1893 = vadd.xlane.f32.xlu0 %v2639_v57 }
 0x57c   : > { %v2641_v7 = vpop.eup %2640 }
 0x57e   : > { %1895 = vadd.xlane.f32.xlu1 %v2641_v7 }
 0x5eb   : > { %v1870_v58 = vpop.xlane.xlu0 %1869 }
 0x5ec   : > { %2642 = vlog2.f32 %v1870_v58 }
 0x5ef   : > { %v1872_v60 = vpop.xlane.xlu1 %1871  ;;  %v1866_v61 = vpop.xlane.xlu0 %1865 }
 0x5f0   : > { %2644 = vlog2.f32 %v1872_v60 }
 0x5f1   : > { %2646 = vlog2.f32 %v1866_v61 }
 0x5f3   : > { %v1868_v9 = vpop.xlane.xlu1 %1867 }
 0x5f4   : > { %2648 = vlog2.f32 %v1868_v9  ;;  %v1878_v63 = vpop.xlane.xlu0 %1877 }
 0x5f5   : > { %2650 = vlog2.f32 %v1878_v63 }
 0x5f6   : > { %v2643_v0 = vpop.eup %2642 }
 0x5f7   : > { %v1902_v10 = vmul.f32 0.6931472, %v2643_v0  ;;  %v1880_v5 = vpop.xlane.xlu1 %1879 }
 0x5f8   : > { %2652 = vlog2.f32 %v1880_v5  ;;  %v1874_v30 = vpop.xlane.xlu0 %1873 }
 0x5f9   : > { %v1931_v8 = vadd.f32 %v1902_v10, %v3263_v36  ;;  %2654 = vlog2.f32 %v1874_v30 }
 0x5fa   : > { %v2645_v11 = vpop.eup %2644 }
 0x5fb   : > { %v2647_v29 = vpop.eup %2646  ;;  %v1948_v15 = vsub.f32 %v3215_v1, %v1931_v8  ;;  %v1904_v18 = vmul.f32 0.6931472, %v2645_v11  ;;  %v1876_v19 = vpop.xlane.xlu1 %1875 }
 0x5fc   : > { %v1898_v22 = vmul.f32 0.6931472, %v2647_v29  ;;  %2656 = vlog2.f32 %v1876_v19  ;;  %v1886_v24 = vpop.xlane.xlu0 %1885 }
 0x5fd   : > { %1965 = vst [vmem:[%s3332_s21 + $0x10] sm:$0xff] %v1948_v15  ;;  %v1932_v36 = vadd.f32 %v1904_v18, %v3271_v40  ;;  %2658 = vlog2.f32 %v1886_v24 }
 0x5fe   : > { %v2649_v25 = vpop.eup %2648  ;;  %v1929_v38 = vadd.f32 %v1898_v22, %v3267_v51 }
 0x5ff   : > { %v2651_v20 = vpop.eup %2650  ;;  %v1949_v39 = vsub.f32 %v3221_v26, %v1932_v36  ;;  %v1900_v43 = vmul.f32 0.6931472, %v2649_v25  ;;  %v1888_v53 = vpop.xlane.xlu1 %1887 }
 0x600   : > { %v1946_v1 = vsub.f32 %v3217_v4, %v1929_v38  ;;  %v1910_v44 = vmul.f32 0.6931472, %v2651_v20  ;;  %2660 = vlog2.f32 %v1888_v53  ;;  %v1882_v45 = vpop.xlane.xlu0 %1881 }
 0x601   : > { %1966 = vst [vmem:[%s3332_s21 + $0x18] sm:$0xff] %v1949_v39  ;;  %v1930_v48 = vadd.f32 %v1900_v43, %v3275_v42  ;;  %2662 = vlog2.f32 %v1882_v45 }
 0x602   : > { %v2653_v40 = vpop.eup %2652  ;;  %1963 = vst [vmem:[%s3332_s21] sm:$0xff] %v1946_v1  ;;  %v1935_v51 = vadd.f32 %v1910_v44, %v3279_v54 }
 0x603   : > { %v2655_v49 = vpop.eup %2654  ;;  %v1947_v26 = vsub.f32 %v3223_v28, %v1930_v48  ;;  %v1912_v50 = vmul.f32 0.6931472, %v2653_v40  ;;  %v1884_v55 = vpop.xlane.xlu1 %1883 }
 0x604   : > { %v1952_v4 = vsub.f32 %v3227_v35, %v1935_v51  ;;  %v1906_v56 = vmul.f32 0.6931472, %v2655_v49  ;;  %2664 = vlog2.f32 %v1884_v55  ;;  %v1890_v57 = vpop.xlane.xlu0 %1889 }
 0x605   : > { %1964 = vst [vmem:[%s3332_s21 + $0x8] sm:$0xff] %v1947_v26  ;;  %v1936_v42 = vadd.f32 %v1912_v50, %v3283_v46  ;;  %2666 = vlog2.f32 %v1890_v57 }
 0x606   : > { %v2657_v7 = vpop.eup %2656  ;;  %1969 = vst [vmem:[%s3332_s21 + $0x30] sm:$0xff] %v1952_v4  ;;  %v1933_v54 = vadd.f32 %v1906_v56, %v3287_v52 }
 0x607   : > { %v2659_v58 = vpop.eup %2658  ;;  %v1953_v28 = vsub.f32 %v3229_v12, %v1936_v42  ;;  %v1908_v60 = vmul.f32 0.6931472, %v2657_v7  ;;  %v1892_v61 = vpop.xlane.xlu1 %1891 }
 0x608   : > { %v1950_v35 = vsub.f32 %v3233_v13, %v1933_v54  ;;  %v1918_v9 = vmul.f32 0.6931472, %v2659_v58  ;;  %2668 = vlog2.f32 %v1892_v61  ;;  %v1894_v63 = vpop.xlane.xlu0 %1893 }
 0x609   : > { %1970 = vst [vmem:[%s3332_s21 + $0x38] sm:$0xff] %v1953_v28  ;;  %v1934_v46 = vadd.f32 %v1908_v60, %v3291_v2  ;;  %2670 = vlog2.f32 %v1894_v63 }
 0x60a   : > { %v2661_v0 = vpop.eup %2660  ;;  %1967 = vst [vmem:[%s3332_s21 + $0x20] sm:$0xff] %v1950_v35  ;;  %v1939_v52 = vadd.f32 %v1918_v9, %v3295_v59 }
 0x60b   : > { %v2663_v10 = vpop.eup %2662  ;;  %v1951_v12 = vsub.f32 %v3235_v14, %v1934_v46  ;;  %v1920_v5 = vmul.f32 0.6931472, %v2661_v0  ;;  %v1896_v30 = vpop.xlane.xlu1 %1895 }
 0x60c   : > { %v1956_v13 = vsub.f32 %v3238_v16, %v1939_v52  ;;  %v1914_v8 = vmul.f32 0.6931472, %v2663_v10  ;;  %2672 = vlog2.f32 %v1896_v30 }
 0x60d   : > { %1968 = vst [vmem:[%s3332_s21 + $0x28] sm:$0xff] %v1951_v12  ;;  %v1940_v11 = vadd.f32 %v1920_v5, %v3299_v62 }
 0x60e   : > { %v2665_v2 = vpop.eup %2664  ;;  %1973 = vst [vmem:[%s3332_s21 + $0x50] sm:$0xff] %v1956_v13  ;;  %v1937_v29 = vadd.f32 %v1914_v8, %v3303_v3 }
 0x60f   : > { %v2667_v59 = vpop.eup %2666  ;;  %v1957_v15 = vsub.f32 %v3241_v32, %v1940_v11  ;;  %v1916_v14 = vmul.f32 0.6931472, %v2665_v2 }
 0x610   : > { %v1954_v18 = vsub.f32 %v3245_v31, %v1937_v29  ;;  %v1922_v19 = vmul.f32 0.6931472, %v2667_v59 }
 0x611   : > { %1974 = vst [vmem:[%s3332_s21 + $0x58] sm:$0xff] %v1957_v15  ;;  %v1938_v16 = vadd.f32 %v1916_v14, %v3307_v6 }
 0x612   : > { %v2669_v22 = vpop.eup %2668  ;;  %1971 = vst [vmem:[%s3332_s21 + $0x40] sm:$0xff] %v1954_v18  ;;  %v1941_v62 = vadd.f32 %v1922_v19, %v3311_v17 }
 0x613   : > { %v2671_v24 = vpop.eup %2670  ;;  %v1955_v3 = vsub.f32 %v3247_v34, %v1938_v16  ;;  %v1924_v36 = vmul.f32 0.6931472, %v2669_v22 }
 0x614   : > { %v1958_v32 = vsub.f32 %v3251_v23, %v1941_v62  ;;  %v1926_v25 = vmul.f32 0.6931472, %v2671_v24 }
 0x615   : > { %1972 = vst [vmem:[%s3332_s21 + $0x48] sm:$0xff] %v1955_v3  ;;  %v1942_v31 = vadd.f32 %v1924_v36, %v3315_v21 }
 0x616   : > { %v2673_v38 = vpop.eup %2672  ;;  %1975 = vst [vmem:[%s3332_s21 + $0x60] sm:$0xff] %v1958_v32  ;;  %v1943_v6 = vadd.f32 %v1926_v25, %v3319_v37 }
 0x617   : > { %v1959_v20 = vsub.f32 %v3253_v47, %v1942_v31  ;;  %v1928_v39 = vmul.f32 0.6931472, %v2673_v38 }
 0x618   : > { %v1960_v17 = vsub.f32 %v3256_v27, %v1943_v6 }
 0x619   : > { %1976 = vst [vmem:[%s3332_s21 + $0x68] sm:$0xff] %v1959_v20  ;;  %v1944_v34 = vadd.f32 %v1928_v39, %v3323_v41 }
 0x61a   : > { %1977 = vst [vmem:[%s3332_s21 + $0x70] sm:$0xff] %v1960_v17 }
 0x61b   : > { %v1961_v43 = vsub.f32 %v3259_v33, %v1944_v34 }
 0x61d   : > { %1978 = vst [vmem:[%s3332_s21 + $0x78] sm:$0xff] %v1961_v43 }
 0x61e PF: > { %s19_s17 = sadd.s32 1, %s2744_s17   ;;  %s3429_s12 = sld [smem:[#allocation5_spill]] }
 0x61f   : > { %p16_p11 = scmp.ge.s32.totalorder %s19_s17, 10   ;;  %s3430_s13 = sld [smem:[#allocation6_spill]] }
 0x620   : > { %s3431_s16 = sld [smem:[#allocation7_spill]]  ;;  %s3432_s15 = sld [smem:[#allocation8_spill]] }
 0x621   : > { %s3433_s19 = sld [smem:[#allocation9_spill]]  ;;  %s3434_s30 = smov %s2716_s10 }
 0x622   : > { %s3435_s10 = smov %s2862_s25  ;;  %s3436_s11 = smov %s2732_s14 }
 0x623   :  { %18 = sbr.rel (!%p16_p11) target bundleno = 7 (0x7), region = 158 }
 0x626   : > { %s3437_s14 = smov %s3431_s16 }
 0x627   : > { %s3438_s16 = smov %s3433_s19 }

</bundles_post_ra>
